<compile_context>
chip_gen: v7x
topology: tpu7x:2x2x1
jax: 0.10.0
libtpu: 0.0.40
codegen_flags: <defaults>
</compile_context>

<pallas_src>
import functools

import jax
import jax.numpy as jnp
import numpy as np
from jax.experimental import pallas as pl
from jax.experimental.pallas import tpu as pltpu


def _round_up(x, m):
    return (x + m - 1) // m * m


def _polyline_kernel(x_ref, valid_ref, expand_ref, mavg_ref,
                     w0_ref, wtop_ref, wbot_ref, b_ref, g_ref, bt_ref,
                     out_ref, *, n_layer, use_layernorm, n_node, hidden,
                     hidden_h):
    """One grid step = one tile of `tp` polylines.

    Layout: (tp, n_node*hidden_h) for every activation -- lane-dense when
    n_node*hidden_h >= 128 (8*16 = 128 for the reference config).
    """
    f32 = jnp.float32
    nnh = n_node * hidden_h
    in_dtype = x_ref.dtype

    # Node-validity expanded from (tp, n_node) to (tp, n_node*hidden_h) on the
    # (otherwise idle) MXU.  Values are exactly {0, 1}.
    valid = jnp.dot(valid_ref[...], expand_ref[...],
                    preferred_element_type=f32)                 # (tp, nnh)

    h = None          # carried masked activations, (tp, nnh), input dtype
    pooled_b = None   # per-polyline node-max, replicated over node groups

    for layer in range(n_layer):                                # static unroll
        if layer == 0:
            pre = jnp.dot(x_ref[...], w0_ref[...],
                          preferred_element_type=f32)           # (tp, nnh)
        else:
            # carried x = [h, broadcast(pooled)]  =>  split-weight trick:
            #   x @ W = h @ (I (x) W_top) + pooled_bcast @ (I (x) W_bot)
            # (invalid nodes differ from the reference here but are re-masked
            #  below and never reach any output)
            pre = (jnp.dot(h, wtop_ref[layer - 1],
                           preferred_element_type=f32)
                   + jnp.dot(pooled_b, wbot_ref[layer - 1],
                             preferred_element_type=f32))
        pre = pre + b_ref[layer][None, :].astype(f32)

        if use_layernorm:
            # Per-node LayerNorm.  The block-averaging matrix computes the
            # mean (and broadcasts it back) on the MXU; centered two-pass var.
            mu = jnp.dot(pre, mavg_ref[...], preferred_element_type=f32)
            d = pre - mu
            var = jnp.dot(d * d, mavg_ref[...], preferred_element_type=f32)
            pre = d * jax.lax.rsqrt(var + 1e-5)
            pre = (pre * g_ref[layer][None, :].astype(f32)
                   + bt_ref[layer][None, :].astype(f32))

        hr = jnp.maximum(pre, 0.0)                              # ReLU (>= 0)
        # invalid nodes -> 0; since hr >= 0 the zero-mask yields the same
        # node-max as the reference -inf mask, and all-invalid polylines pool
        # to 0 exactly like the reference masked_fill(., 0).
        h0 = hr * valid                                         # (tp, nnh) f32

        # Per-polyline max over nodes, already broadcast over the node groups:
        # lane rotations by multiples of hidden_h stay inside one polyline
        # because the minor dim is exactly n_node*hidden_h.
        pooled_b = h0
        if n_node > 1:
            if n_node & (n_node - 1) == 0:                      # power of two
                s = hidden_h
                while s < nnh:
                    pooled_b = jnp.maximum(pooled_b,
                                           pltpu.roll(pooled_b, s, 1))
                    s *= 2
            else:
                r = h0
                for _ in range(n_node - 1):
                    r = pltpu.roll(r, hidden_h, 1)
                    pooled_b = jnp.maximum(pooled_b, r)

        if layer < n_layer - 1:
            # feed the next MXU dot in the input dtype (bf16 stays bf16)
            h = h0.astype(in_dtype)
            pooled_b = pooled_b.astype(in_dtype)

    # Collapsed epilogue: emb = cat([pooled, pooled]); pooled_b already holds
    # pooled replicated across node groups, so its first `hidden` lanes are
    # exactly the result (all-invalid polylines are already 0).
    if n_node >= 2:
        emb = pooled_b[:, :hidden]
    else:
        emb = jnp.concatenate([pooled_b, pooled_b], axis=-1)
    out_ref[...] = emb.astype(out_ref.dtype)


def _pick_tile(p32, block_polylines):
    """Largest tile (multiple of 32, <= block_polylines) dividing p32,
    preferring an even number of grid steps (v7x: 2 TCs share 'parallel')."""
    units = p32 // 32
    dmax = max(1, min(block_polylines // 32, units))
    best = None
    best_even = None
    for d in range(dmax, 0, -1):
        if units % d:
            continue
        g = units // d
        if best is None:
            best = d
        if best_even is None and (g == 1 or g % 2 == 0):
            best_even = d
            break
    d = best_even if best_even is not None else best
    return 32 * d


def polyline_encoder(x, invalid, w, b, gamma, beta, *, use_layernorm=True,
                     block_polylines=512):
    """x: [n_sc, n_mp, n_node, hidden], invalid: [n_sc, n_mp, n_node] bool.
    w: [n_layer, hidden, hidden//2], b/gamma/beta: [n_layer, hidden//2].
    Returns emb: [n_sc, n_mp, hidden] in x.dtype."""
    n_sc, n_mp, n_node, hidden = x.shape
    n_layer, w_in, hidden_h = w.shape
    assert w_in == hidden and hidden_h * 2 == hidden, (
        "PointNet MLP expects Linear(hidden -> hidden // 2) per layer")
    p = n_sc * n_mp
    nnh = n_node * hidden_h
    in_dtype = x.dtype

    # ---- flatten (metadata-only reshape) + minimal pad to a multiple of 32
    x2 = x.reshape(p, n_node * hidden)
    valid2 = jnp.logical_not(invalid).reshape(p, n_node).astype(in_dtype)
    p32 = _round_up(p, 32)
    if p32 != p:
        # TODO(synk): the tail is handled by a (small, <=31-row) pad copy; for
        # realistic sizes p is a multiple of 32 and this branch is skipped.
        x2 = jnp.pad(x2, ((0, p32 - p), (0, 0)))
        valid2 = jnp.pad(valid2, ((0, p32 - p), (0, 0)))

    # ---- VMEM accounting with lane-padded minor dims, then tile choice
    lane = 128
    isz = jnp.dtype(in_dtype).itemsize
    nnh_pad = _round_up(nnh, lane)
    per_poly = (2 * _round_up(n_node * hidden, lane) * isz    # x (double-buf)
                + 2 * _round_up(n_node, lane) * isz           # valid (double-buf)
                + 2 * _round_up(hidden, lane) * isz           # out (double-buf)
                + 8 * nnh_pad * 4)                            # live f32 temps
    const_bytes = 2 * ((n_node * hidden + 2 * max(n_layer - 1, 1) * nnh
                        + n_node + nnh) * nnh_pad * 4
                       + 3 * n_layer * nnh_pad * 4)
    budget = 24 * 2**20
    tp_cap = max(32, (budget // per_poly) // 32 * 32)
    tp = _pick_tile(p32, min(max(32, block_polylines), tp_cap))
    grid = p32 // tp
    est = tp * per_poly + const_bytes
    vmem_limit = int(min(40 * 2**20, max(16 * 2**20, 2 * est)))

    # ---- constant operands (tiny; node-block-diagonal weights etc.)
    eye = jnp.eye(n_node, dtype=jnp.float32)
    w0k = jnp.kron(eye, w[0].astype(jnp.float32)).astype(in_dtype)
    if n_layer > 1:
        wtopk = jnp.stack(
            [jnp.kron(eye, w[l, :hidden_h, :].astype(jnp.float32))
             for l in range(1, n_layer)]).astype(in_dtype)
        wbotk = jnp.stack(
            [jnp.kron(eye, w[l, hidden_h:, :].astype(jnp.float32))
             for l in range(1, n_layer)]).astype(in_dtype)
    else:
        wtopk = jnp.zeros((1, nnh, nnh), in_dtype)
        wbotk = jnp.zeros((1, nnh, nnh), in_dtype)
    b_rep = jnp.tile(b.astype(jnp.float32), (1, n_node))           # (L, nnh)
    g_rep = jnp.tile(gamma.astype(jnp.float32), (1, n_node))
    bt_rep = jnp.tile(beta.astype(jnp.float32), (1, n_node))
    expand = jnp.kron(eye, jnp.ones((1, hidden_h),
                                    jnp.float32)).astype(in_dtype)  # (nn, nnh)
    mavg = jnp.kron(eye, jnp.full((hidden_h, hidden_h), 1.0 / hidden_h,
                                  jnp.float32))                     # (nnh, nnh)

    kernel = functools.partial(
        _polyline_kernel, n_layer=n_layer, use_layernorm=use_layernorm,
        n_node=n_node, hidden=hidden, hidden_h=hidden_h)

    out = pl.pallas_call(
        kernel,
        out_shape=jax.ShapeDtypeStruct((p32, hidden), in_dtype),
        grid_spec=pltpu.PrefetchScalarGridSpec(
            num_scalar_prefetch=0,
            grid=(grid,),
            in_specs=[
                pl.BlockSpec((tp, n_node * hidden), lambda i: (i, 0)),   # x
                pl.BlockSpec((tp, n_node), lambda i: (i, 0)),            # valid
                pl.BlockSpec((n_node, nnh), lambda i: (0, 0)),           # expand
                pl.BlockSpec((nnh, nnh), lambda i: (0, 0)),              # mavg
                pl.BlockSpec((n_node * hidden, nnh), lambda i: (0, 0)),  # w0k
                pl.BlockSpec((max(n_layer - 1, 1), nnh, nnh),
                             lambda i: (0, 0, 0)),                       # wtopk
                pl.BlockSpec((max(n_layer - 1, 1), nnh, nnh),
                             lambda i: (0, 0, 0)),                       # wbotk
                pl.BlockSpec((n_layer, nnh), lambda i: (0, 0)),          # b
                pl.BlockSpec((n_layer, nnh), lambda i: (0, 0)),          # gamma
                pl.BlockSpec((n_layer, nnh), lambda i: (0, 0)),          # beta
            ],
            out_specs=pl.BlockSpec((tp, hidden), lambda i: (i, 0)),
        ),
        compiler_params=pltpu.CompilerParams(
            dimension_semantics=("parallel",),
            vmem_limit_bytes=vmem_limit),
    )(x2, valid2, expand, mavg, w0k, wtopk, wbotk, b_rep, g_rep, bt_rep)

    return out[:p].reshape(n_sc, n_mp, hidden)


def polyline_encoder_ref(x, invalid, w, b, gamma, beta, *, use_layernorm=True):
    """Pure-JAX reference mirroring the PyTorch forward."""
    n_sc, n_mp, n_node, hidden = x.shape
    n_layer = w.shape[0]
    inv3 = invalid[..., None]
    for layer in range(n_layer):
        h = jnp.einsum("smnh,hk->smnk", x, w[layer]) + b[layer]
        if use_layernorm:
            mu = jnp.mean(h, axis=-1, keepdims=True)
            var = jnp.mean((h - mu) ** 2, axis=-1, keepdims=True)
            h = (h - mu) / jnp.sqrt(var + 1e-5) * gamma[layer] + beta[layer]
        h = jnp.maximum(h, 0.0)
        h = jnp.where(inv3, -jnp.inf, h)
        pooled = jnp.max(h, axis=2, keepdims=True)
        x = jnp.concatenate([h, jnp.broadcast_to(pooled, h.shape)], axis=-1)
        x = jnp.where(inv3, 0.0, x)
    emb = jnp.max(jnp.where(inv3, -jnp.inf, x), axis=2)
    emb = jnp.where(jnp.all(invalid, axis=-1, keepdims=True), 0.0, emb)
    return emb


if __name__ == "__main__":
    # small shapes consistent with the module's forward
    n_sc, n_mp, n_node, hidden = 2, 8, 8, 32
    n_layer = 3
    hidden_h = hidden // 2

    key = jax.random.PRNGKey(0)
    kx, kinv, kw, kb, kg, kbt = jax.random.split(key, 6)

    x = jax.random.normal(kx, (n_sc, n_mp, n_node, hidden), dtype=jnp.float32)
    invalid = jax.random.bernoulli(kinv, p=0.3, shape=(n_sc, n_mp, n_node))
    # make one polyline fully invalid to exercise the all-invalid path
    invalid = invalid.at[0, 0, :].set(True)

    # deterministic stacked parameters (Linear + LayerNorm per layer)
    w = jax.random.normal(kw, (n_layer, hidden, hidden_h), jnp.float32) * 0.1
    b = jax.random.normal(kb, (n_layer, hidden_h), jnp.float32) * 0.01
    gamma = 1.0 + 0.05 * jax.random.normal(kg, (n_layer, hidden_h), jnp.float32)
    beta = 0.05 * jax.random.normal(kbt, (n_layer, hidden_h), jnp.float32)

    emb = polyline_encoder(x, invalid, w, b, gamma, beta)
    emb = jax.block_until_ready(emb)

    emb_ref = polyline_encoder_ref(x, invalid, w, b, gamma, beta)
    np.testing.assert_allclose(np.asarray(emb), np.asarray(emb_ref),
                               rtol=1e-5, atol=1e-5)
    assert emb.shape == (n_sc, n_mp, hidden)
    print("KERNEL_OK")
</pallas_src>

<mosaic_0001>
module attributes {stable_mosaic.version = 11 : i64} {
  func.func @_polyline_kernel(%arg0: i32, %arg1: memref<32x256xf32, #tpu.memory_space<vmem>>, %arg2: memref<32x8xf32, #tpu.memory_space<vmem>>, %arg3: memref<8x128xf32, #tpu.memory_space<vmem>>, %arg4: memref<128x128xf32, #tpu.memory_space<vmem>>, %arg5: memref<256x128xf32, #tpu.memory_space<vmem>>, %arg6: memref<2x128x128xf32, #tpu.memory_space<vmem>>, %arg7: memref<2x128x128xf32, #tpu.memory_space<vmem>>, %arg8: memref<3x128xf32, #tpu.memory_space<vmem>>, %arg9: memref<3x128xf32, #tpu.memory_space<vmem>>, %arg10: memref<3x128xf32, #tpu.memory_space<vmem>>, %arg11: memref<32x32xf32, #tpu.memory_space<vmem>>) attributes {dimension_semantics = [#tpu.dimension_semantics<parallel>], iteration_bounds = array<i64: 1>, scalar_prefetch = 0 : i64, scratch_operands = 0 : i64, tpu.core_type = #tpu.core_type<tc>, window_params = [{transform_indices = @transform_0, window_bounds = array<i64: 32, 256>}, {transform_indices = @transform_1, window_bounds = array<i64: 32, 8>}, {pipeline_mode = #tpu.pipeline_mode<synchronous>, transform_indices = @transform_2, window_bounds = array<i64: 8, 128>}, {pipeline_mode = #tpu.pipeline_mode<synchronous>, transform_indices = @transform_3, window_bounds = array<i64: 128, 128>}, {pipeline_mode = #tpu.pipeline_mode<synchronous>, transform_indices = @transform_4, window_bounds = array<i64: 256, 128>}, {pipeline_mode = #tpu.pipeline_mode<synchronous>, transform_indices = @transform_5, window_bounds = array<i64: 2, 128, 128>}, {pipeline_mode = #tpu.pipeline_mode<synchronous>, transform_indices = @transform_6, window_bounds = array<i64: 2, 128, 128>}, {pipeline_mode = #tpu.pipeline_mode<synchronous>, transform_indices = @transform_7, window_bounds = array<i64: 3, 128>}, {pipeline_mode = #tpu.pipeline_mode<synchronous>, transform_indices = @transform_8, window_bounds = array<i64: 3, 128>}, {pipeline_mode = #tpu.pipeline_mode<synchronous>, transform_indices = @transform_9, window_bounds = array<i64: 3, 128>}, {transform_indices = @transform_10, window_bounds = array<i64: 32, 32>}]} {
    %c0 = arith.constant 0 : index
    %c0_0 = arith.constant 0 : index
    %0 = vector.load %arg2[%c0, %c0_0] : memref<32x8xf32, #tpu.memory_space<vmem>>, vector<32x8xf32>
    %c0_1 = arith.constant 0 : index
    %c0_2 = arith.constant 0 : index
    %1 = vector.load %arg3[%c0_1, %c0_2] : memref<8x128xf32, #tpu.memory_space<vmem>>, vector<8x128xf32>
    %cst = arith.constant dense<0.000000e+00> : vector<32x128xf32>
    %2 = tpu.matmul %0, %1, %cst {dimension_numbers = #tpu.dot_dimension_numbers<[1], [0], [0], [1], [0, 0, 1, 1], [], []>} : vector<32x8xf32>, vector<8x128xf32>, vector<32x128xf32> -> vector<32x128xf32>
    %c0_3 = arith.constant 0 : index
    %c0_4 = arith.constant 0 : index
    %3 = vector.load %arg1[%c0_3, %c0_4] : memref<32x256xf32, #tpu.memory_space<vmem>>, vector<32x256xf32>
    %c0_5 = arith.constant 0 : index
    %c0_6 = arith.constant 0 : index
    %4 = vector.load %arg5[%c0_5, %c0_6] : memref<256x128xf32, #tpu.memory_space<vmem>>, vector<256x128xf32>
    %cst_7 = arith.constant dense<0.000000e+00> : vector<32x128xf32>
    %5 = tpu.matmul %3, %4, %cst_7 {dimension_numbers = #tpu.dot_dimension_numbers<[1], [0], [0], [1], [0, 0, 1, 1], [], []>} : vector<32x256xf32>, vector<256x128xf32>, vector<32x128xf32> -> vector<32x128xf32>
    %c0_8 = arith.constant 0 : index
    %c0_9 = arith.constant 0 : index
    %6 = vector.load %arg8[%c0_8, %c0_9] : memref<3x128xf32, #tpu.memory_space<vmem>>, vector<1x128xf32>
    %7 = vector.shape_cast %6 : vector<1x128xf32> to vector<128xf32>
    %8 = vector.shape_cast %7 : vector<128xf32> to vector<1x128xf32>
    %9 = vector.broadcast %8 : vector<1x128xf32> to vector<32x128xf32>
    %10 = arith.addf %5, %9 : vector<32x128xf32>
    %c0_10 = arith.constant 0 : index
    %c0_11 = arith.constant 0 : index
    %11 = vector.load %arg4[%c0_10, %c0_11] : memref<128x128xf32, #tpu.memory_space<vmem>>, vector<128x128xf32>
    %cst_12 = arith.constant dense<0.000000e+00> : vector<32x128xf32>
    %12 = tpu.matmul %10, %11, %cst_12 {dimension_numbers = #tpu.dot_dimension_numbers<[1], [0], [0], [1], [0, 0, 1, 1], [], []>} : vector<32x128xf32>, vector<128x128xf32>, vector<32x128xf32> -> vector<32x128xf32>
    %13 = arith.subf %10, %12 : vector<32x128xf32>
    %14 = arith.mulf %13, %13 : vector<32x128xf32>
    %c0_13 = arith.constant 0 : index
    %c0_14 = arith.constant 0 : index
    %15 = vector.load %arg4[%c0_13, %c0_14] : memref<128x128xf32, #tpu.memory_space<vmem>>, vector<128x128xf32>
    %cst_15 = arith.constant dense<0.000000e+00> : vector<32x128xf32>
    %16 = tpu.matmul %14, %15, %cst_15 {dimension_numbers = #tpu.dot_dimension_numbers<[1], [0], [0], [1], [0, 0, 1, 1], [], []>} : vector<32x128xf32>, vector<128x128xf32>, vector<32x128xf32> -> vector<32x128xf32>
    %cst_16 = arith.constant 9.99999974E-6 : f32
    %17 = vector.broadcast %cst_16 : f32 to vector<32x128xf32>
    %18 = arith.addf %16, %17 : vector<32x128xf32>
    %19 = math.rsqrt %18 : vector<32x128xf32>
    %20 = arith.mulf %13, %19 : vector<32x128xf32>
    %c0_17 = arith.constant 0 : index
    %c0_18 = arith.constant 0 : index
    %21 = vector.load %arg9[%c0_17, %c0_18] : memref<3x128xf32, #tpu.memory_space<vmem>>, vector<1x128xf32>
    %22 = vector.shape_cast %21 : vector<1x128xf32> to vector<128xf32>
    %23 = vector.shape_cast %22 : vector<128xf32> to vector<1x128xf32>
    %24 = vector.broadcast %23 : vector<1x128xf32> to vector<32x128xf32>
    %25 = arith.mulf %20, %24 : vector<32x128xf32>
    %c0_19 = arith.constant 0 : index
    %c0_20 = arith.constant 0 : index
    %26 = vector.load %arg10[%c0_19, %c0_20] : memref<3x128xf32, #tpu.memory_space<vmem>>, vector<1x128xf32>
    %27 = vector.shape_cast %26 : vector<1x128xf32> to vector<128xf32>
    %28 = vector.shape_cast %27 : vector<128xf32> to vector<1x128xf32>
    %29 = vector.broadcast %28 : vector<1x128xf32> to vector<32x128xf32>
    %30 = arith.addf %25, %29 : vector<32x128xf32>
    %cst_21 = arith.constant 0.000000e+00 : f32
    %31 = vector.broadcast %cst_21 : f32 to vector<32x128xf32>
    %32 = arith.maximumf %30, %31 : vector<32x128xf32>
    %33 = arith.mulf %32, %2 : vector<32x128xf32>
    %c16_i32 = arith.constant 16 : i32
    %34 = tpu.dynamic_rotate %33 by %c16_i32 dim 1 : vector<32x128xf32>, i32 -> vector<32x128xf32>
    %35 = arith.maximumf %33, %34 : vector<32x128xf32>
    %c32_i32 = arith.constant 32 : i32
    %36 = tpu.dynamic_rotate %35 by %c32_i32 dim 1 : vector<32x128xf32>, i32 -> vector<32x128xf32>
    %37 = arith.maximumf %35, %36 : vector<32x128xf32>
    %c64_i32 = arith.constant 64 : i32
    %38 = tpu.dynamic_rotate %37 by %c64_i32 dim 1 : vector<32x128xf32>, i32 -> vector<32x128xf32>
    %39 = arith.maximumf %37, %38 : vector<32x128xf32>
    %c0_22 = arith.constant 0 : index
    %c0_23 = arith.constant 0 : index
    %c0_24 = arith.constant 0 : index
    %40 = vector.load %arg6[%c0_22, %c0_23, %c0_24] : memref<2x128x128xf32, #tpu.memory_space<vmem>>, vector<1x128x128xf32>
    %41 = vector.shape_cast %40 : vector<1x128x128xf32> to vector<128x128xf32>
    %cst_25 = arith.constant dense<0.000000e+00> : vector<32x128xf32>
    %42 = tpu.matmul %33, %41, %cst_25 {dimension_numbers = #tpu.dot_dimension_numbers<[1], [0], [0], [1], [0, 0, 1, 1], [], []>} : vector<32x128xf32>, vector<128x128xf32>, vector<32x128xf32> -> vector<32x128xf32>
    %c0_26 = arith.constant 0 : index
    %c0_27 = arith.constant 0 : index
    %c0_28 = arith.constant 0 : index
    %43 = vector.load %arg7[%c0_26, %c0_27, %c0_28] : memref<2x128x128xf32, #tpu.memory_space<vmem>>, vector<1x128x128xf32>
    %44 = vector.shape_cast %43 : vector<1x128x128xf32> to vector<128x128xf32>
    %cst_29 = arith.constant dense<0.000000e+00> : vector<32x128xf32>
    %45 = tpu.matmul %39, %44, %cst_29 {dimension_numbers = #tpu.dot_dimension_numbers<[1], [0], [0], [1], [0, 0, 1, 1], [], []>} : vector<32x128xf32>, vector<128x128xf32>, vector<32x128xf32> -> vector<32x128xf32>
    %46 = arith.addf %42, %45 : vector<32x128xf32>
    %c1 = arith.constant 1 : index
    %c0_30 = arith.constant 0 : index
    %47 = vector.load %arg8[%c1, %c0_30] : memref<3x128xf32, #tpu.memory_space<vmem>>, vector<1x128xf32>
    %48 = vector.shape_cast %47 : vector<1x128xf32> to vector<128xf32>
    %49 = vector.shape_cast %48 : vector<128xf32> to vector<1x128xf32>
    %50 = vector.broadcast %49 : vector<1x128xf32> to vector<32x128xf32>
    %51 = arith.addf %46, %50 : vector<32x128xf32>
    %c0_31 = arith.constant 0 : index
    %c0_32 = arith.constant 0 : index
    %52 = vector.load %arg4[%c0_31, %c0_32] : memref<128x128xf32, #tpu.memory_space<vmem>>, vector<128x128xf32>
    %cst_33 = arith.constant dense<0.000000e+00> : vector<32x128xf32>
    %53 = tpu.matmul %51, %52, %cst_33 {dimension_numbers = #tpu.dot_dimension_numbers<[1], [0], [0], [1], [0, 0, 1, 1], [], []>} : vector<32x128xf32>, vector<128x128xf32>, vector<32x128xf32> -> vector<32x128xf32>
    %54 = arith.subf %51, %53 : vector<32x128xf32>
    %55 = arith.mulf %54, %54 : vector<32x128xf32>
    %c0_34 = arith.constant 0 : index
    %c0_35 = arith.constant 0 : index
    %56 = vector.load %arg4[%c0_34, %c0_35] : memref<128x128xf32, #tpu.memory_space<vmem>>, vector<128x128xf32>
    %cst_36 = arith.constant dense<0.000000e+00> : vector<32x128xf32>
    %57 = tpu.matmul %55, %56, %cst_36 {dimension_numbers = #tpu.dot_dimension_numbers<[1], [0], [0], [1], [0, 0, 1, 1], [], []>} : vector<32x128xf32>, vector<128x128xf32>, vector<32x128xf32> -> vector<32x128xf32>
    %cst_37 = arith.constant 9.99999974E-6 : f32
    %58 = vector.broadcast %cst_37 : f32 to vector<32x128xf32>
    %59 = arith.addf %57, %58 : vector<32x128xf32>
    %60 = math.rsqrt %59 : vector<32x128xf32>
    %61 = arith.mulf %54, %60 : vector<32x128xf32>
    %c1_38 = arith.constant 1 : index
    %c0_39 = arith.constant 0 : index
    %62 = vector.load %arg9[%c1_38, %c0_39] : memref<3x128xf32, #tpu.memory_space<vmem>>, vector<1x128xf32>
    %63 = vector.shape_cast %62 : vector<1x128xf32> to vector<128xf32>
    %64 = vector.shape_cast %63 : vector<128xf32> to vector<1x128xf32>
    %65 = vector.broadcast %64 : vector<1x128xf32> to vector<32x128xf32>
    %66 = arith.mulf %61, %65 : vector<32x128xf32>
    %c1_40 = arith.constant 1 : index
    %c0_41 = arith.constant 0 : index
    %67 = vector.load %arg10[%c1_40, %c0_41] : memref<3x128xf32, #tpu.memory_space<vmem>>, vector<1x128xf32>
    %68 = vector.shape_cast %67 : vector<1x128xf32> to vector<128xf32>
    %69 = vector.shape_cast %68 : vector<128xf32> to vector<1x128xf32>
    %70 = vector.broadcast %69 : vector<1x128xf32> to vector<32x128xf32>
    %71 = arith.addf %66, %70 : vector<32x128xf32>
    %cst_42 = arith.constant 0.000000e+00 : f32
    %72 = vector.broadcast %cst_42 : f32 to vector<32x128xf32>
    %73 = arith.maximumf %71, %72 : vector<32x128xf32>
    %74 = arith.mulf %73, %2 : vector<32x128xf32>
    %c16_i32_43 = arith.constant 16 : i32
    %75 = tpu.dynamic_rotate %74 by %c16_i32_43 dim 1 : vector<32x128xf32>, i32 -> vector<32x128xf32>
    %76 = arith.maximumf %74, %75 : vector<32x128xf32>
    %c32_i32_44 = arith.constant 32 : i32
    %77 = tpu.dynamic_rotate %76 by %c32_i32_44 dim 1 : vector<32x128xf32>, i32 -> vector<32x128xf32>
    %78 = arith.maximumf %76, %77 : vector<32x128xf32>
    %c64_i32_45 = arith.constant 64 : i32
    %79 = tpu.dynamic_rotate %78 by %c64_i32_45 dim 1 : vector<32x128xf32>, i32 -> vector<32x128xf32>
    %80 = arith.maximumf %78, %79 : vector<32x128xf32>
    %c1_46 = arith.constant 1 : index
    %c0_47 = arith.constant 0 : index
    %c0_48 = arith.constant 0 : index
    %81 = vector.load %arg6[%c1_46, %c0_47, %c0_48] : memref<2x128x128xf32, #tpu.memory_space<vmem>>, vector<1x128x128xf32>
    %82 = vector.shape_cast %81 : vector<1x128x128xf32> to vector<128x128xf32>
    %cst_49 = arith.constant dense<0.000000e+00> : vector<32x128xf32>
    %83 = tpu.matmul %74, %82, %cst_49 {dimension_numbers = #tpu.dot_dimension_numbers<[1], [0], [0], [1], [0, 0, 1, 1], [], []>} : vector<32x128xf32>, vector<128x128xf32>, vector<32x128xf32> -> vector<32x128xf32>
    %c1_50 = arith.constant 1 : index
    %c0_51 = arith.constant 0 : index
    %c0_52 = arith.constant 0 : index
    %84 = vector.load %arg7[%c1_50, %c0_51, %c0_52] : memref<2x128x128xf32, #tpu.memory_space<vmem>>, vector<1x128x128xf32>
    %85 = vector.shape_cast %84 : vector<1x128x128xf32> to vector<128x128xf32>
    %cst_53 = arith.constant dense<0.000000e+00> : vector<32x128xf32>
    %86 = tpu.matmul %80, %85, %cst_53 {dimension_numbers = #tpu.dot_dimension_numbers<[1], [0], [0], [1], [0, 0, 1, 1], [], []>} : vector<32x128xf32>, vector<128x128xf32>, vector<32x128xf32> -> vector<32x128xf32>
    %87 = arith.addf %83, %86 : vector<32x128xf32>
    %c2 = arith.constant 2 : index
    %c0_54 = arith.constant 0 : index
    %88 = vector.load %arg8[%c2, %c0_54] : memref<3x128xf32, #tpu.memory_space<vmem>>, vector<1x128xf32>
    %89 = vector.shape_cast %88 : vector<1x128xf32> to vector<128xf32>
    %90 = vector.shape_cast %89 : vector<128xf32> to vector<1x128xf32>
    %91 = vector.broadcast %90 : vector<1x128xf32> to vector<32x128xf32>
    %92 = arith.addf %87, %91 : vector<32x128xf32>
    %c0_55 = arith.constant 0 : index
    %c0_56 = arith.constant 0 : index
    %93 = vector.load %arg4[%c0_55, %c0_56] : memref<128x128xf32, #tpu.memory_space<vmem>>, vector<128x128xf32>
    %cst_57 = arith.constant dense<0.000000e+00> : vector<32x128xf32>
    %94 = tpu.matmul %92, %93, %cst_57 {dimension_numbers = #tpu.dot_dimension_numbers<[1], [0], [0], [1], [0, 0, 1, 1], [], []>} : vector<32x128xf32>, vector<128x128xf32>, vector<32x128xf32> -> vector<32x128xf32>
    %95 = arith.subf %92, %94 : vector<32x128xf32>
    %96 = arith.mulf %95, %95 : vector<32x128xf32>
    %c0_58 = arith.constant 0 : index
    %c0_59 = arith.constant 0 : index
    %97 = vector.load %arg4[%c0_58, %c0_59] : memref<128x128xf32, #tpu.memory_space<vmem>>, vector<128x128xf32>
    %cst_60 = arith.constant dense<0.000000e+00> : vector<32x128xf32>
    %98 = tpu.matmul %96, %97, %cst_60 {dimension_numbers = #tpu.dot_dimension_numbers<[1], [0], [0], [1], [0, 0, 1, 1], [], []>} : vector<32x128xf32>, vector<128x128xf32>, vector<32x128xf32> -> vector<32x128xf32>
    %cst_61 = arith.constant 9.99999974E-6 : f32
    %99 = vector.broadcast %cst_61 : f32 to vector<32x128xf32>
    %100 = arith.addf %98, %99 : vector<32x128xf32>
    %101 = math.rsqrt %100 : vector<32x128xf32>
    %102 = arith.mulf %95, %101 : vector<32x128xf32>
    %c2_62 = arith.constant 2 : index
    %c0_63 = arith.constant 0 : index
    %103 = vector.load %arg9[%c2_62, %c0_63] : memref<3x128xf32, #tpu.memory_space<vmem>>, vector<1x128xf32>
    %104 = vector.shape_cast %103 : vector<1x128xf32> to vector<128xf32>
    %105 = vector.shape_cast %104 : vector<128xf32> to vector<1x128xf32>
    %106 = vector.broadcast %105 : vector<1x128xf32> to vector<32x128xf32>
    %107 = arith.mulf %102, %106 : vector<32x128xf32>
    %c2_64 = arith.constant 2 : index
    %c0_65 = arith.constant 0 : index
    %108 = vector.load %arg10[%c2_64, %c0_65] : memref<3x128xf32, #tpu.memory_space<vmem>>, vector<1x128xf32>
    %109 = vector.shape_cast %108 : vector<1x128xf32> to vector<128xf32>
    %110 = vector.shape_cast %109 : vector<128xf32> to vector<1x128xf32>
    %111 = vector.broadcast %110 : vector<1x128xf32> to vector<32x128xf32>
    %112 = arith.addf %107, %111 : vector<32x128xf32>
    %cst_66 = arith.constant 0.000000e+00 : f32
    %113 = vector.broadcast %cst_66 : f32 to vector<32x128xf32>
    %114 = arith.maximumf %112, %113 : vector<32x128xf32>
    %115 = arith.mulf %114, %2 : vector<32x128xf32>
    %c16_i32_67 = arith.constant 16 : i32
    %116 = tpu.dynamic_rotate %115 by %c16_i32_67 dim 1 : vector<32x128xf32>, i32 -> vector<32x128xf32>
    %117 = arith.maximumf %115, %116 : vector<32x128xf32>
    %c32_i32_68 = arith.constant 32 : i32
    %118 = tpu.dynamic_rotate %117 by %c32_i32_68 dim 1 : vector<32x128xf32>, i32 -> vector<32x128xf32>
    %119 = arith.maximumf %117, %118 : vector<32x128xf32>
    %c64_i32_69 = arith.constant 64 : i32
    %120 = tpu.dynamic_rotate %119 by %c64_i32_69 dim 1 : vector<32x128xf32>, i32 -> vector<32x128xf32>
    %121 = arith.maximumf %119, %120 : vector<32x128xf32>
    %122 = vector.extract_strided_slice %121 {offsets = [0, 0], sizes = [32, 32], strides = [1, 1]} : vector<32x128xf32> to vector<32x32xf32>
    %c0_70 = arith.constant 0 : index
    %c0_71 = arith.constant 0 : index
    %123 = vector.load %arg11[%c0_70, %c0_71] : memref<32x32xf32, #tpu.memory_space<vmem>>, vector<32x32xf32>
    tpu.vector_store %arg11[%c0_70, %c0_71], %122 {strides = array<i32>} : memref<32x32xf32, #tpu.memory_space<vmem>>, vector<32x32xf32>,
    return
  }
  func.func @transform_0(%arg0: i32) -> (i32, i32) {
    %c0_i32 = arith.constant 0 : i32
    %c0_i32_0 = arith.constant 0 : i32
    return %arg0, %c0_i32 : i32, i32
  }
  func.func @transform_1(%arg0: i32) -> (i32, i32) {
    %c0_i32 = arith.constant 0 : i32
    %c0_i32_0 = arith.constant 0 : i32
    return %arg0, %c0_i32 : i32, i32
  }
  func.func @transform_2(%arg0: i32) -> (i32, i32) {
    %c0_i32 = arith.constant 0 : i32
    %c0_i32_0 = arith.constant 0 : i32
    %c0_i32_1 = arith.constant 0 : i32
    return %c0_i32, %c0_i32_0 : i32, i32
  }
  func.func @transform_3(%arg0: i32) -> (i32, i32) {
    %c0_i32 = arith.constant 0 : i32
    %c0_i32_0 = arith.constant 0 : i32
    %c0_i32_1 = arith.constant 0 : i32
    return %c0_i32, %c0_i32_0 : i32, i32
  }
  func.func @transform_4(%arg0: i32) -> (i32, i32) {
    %c0_i32 = arith.constant 0 : i32
    %c0_i32_0 = arith.constant 0 : i32
    %c0_i32_1 = arith.constant 0 : i32
    return %c0_i32, %c0_i32_0 : i32, i32
  }
  func.func @transform_5(%arg0: i32) -> (i32, i32, i32) {
    %c0_i32 = arith.constant 0 : i32
    %c0_i32_0 = arith.constant 0 : i32
    %c0_i32_1 = arith.constant 0 : i32
    %c0_i32_2 = arith.constant 0 : i32
    return %c0_i32, %c0_i32_0, %c0_i32_1 : i32, i32, i32
  }
  func.func @transform_6(%arg0: i32) -> (i32, i32, i32) {
    %c0_i32 = arith.constant 0 : i32
    %c0_i32_0 = arith.constant 0 : i32
    %c0_i32_1 = arith.constant 0 : i32
    %c0_i32_2 = arith.constant 0 : i32
    return %c0_i32, %c0_i32_0, %c0_i32_1 : i32, i32, i32
  }
  func.func @transform_7(%arg0: i32) -> (i32, i32) {
    %c0_i32 = arith.constant 0 : i32
    %c0_i32_0 = arith.constant 0 : i32
    %c0_i32_1 = arith.constant 0 : i32
    return %c0_i32, %c0_i32_0 : i32, i32
  }
  func.func @transform_8(%arg0: i32) -> (i32, i32) {
    %c0_i32 = arith.constant 0 : i32
    %c0_i32_0 = arith.constant 0 : i32
    %c0_i32_1 = arith.constant 0 : i32
    return %c0_i32, %c0_i32_0 : i32, i32
  }
  func.func @transform_9(%arg0: i32) -> (i32, i32) {
    %c0_i32 = arith.constant 0 : i32
    %c0_i32_0 = arith.constant 0 : i32
    %c0_i32_1 = arith.constant 0 : i32
    return %c0_i32, %c0_i32_0 : i32, i32
  }
  func.func @transform_10(%arg0: i32) -> (i32, i32) {
    %c0_i32 = arith.constant 0 : i32
    %c0_i32_0 = arith.constant 0 : i32
    return %arg0, %c0_i32 : i32, i32
  }
}

</mosaic_0001>

<bundles_post_ra>
// kernel: tpu_custom_call.1
= control target key start
LH: loop header
LB: loop body
LE: loop exit
PB: predicated region body
PF: predicated region fallthrough
CT: control target
= control target key end

     0   :  { %15 = vsyncpa [#allocation3], 0  ;;  %s3220_s0 = inlined_call_operand.hbm [shape: f32[32,256], index: 0, kind: input, shape index: {}]   ;;  %s3221_s1 = inlined_call_operand.vmem [shape: f32[32,8], index: 1, kind: input, shape index: {}]   ;;  %s3222_s2 = inlined_call_operand.vmem [shape: f32[8,128], index: 2, kind: input, shape index: {}]   ;;  %s3223_s3 = inlined_call_operand.hbm [shape: f32[128,128], index: 3, kind: input, shape index: {}]   ;;  %s3224_s4 = inlined_call_operand.hbm [shape: f32[256,128], index: 4, kind: input, shape index: {}]   ;;  %s3225_s5 = inlined_call_operand.hbm [shape: f32[2,128,128], index: 5, kind: input, shape index: {}]   ;;  %s3226_s6 = inlined_call_operand.hbm [shape: f32[2,128,128], index: 6, kind: input, shape index: {}]   ;;  %s3227_s7 = inlined_call_operand.vmem [shape: f32[3,128], index: 7, kind: input, shape index: {}]   ;;  %s3228_s8 = inlined_call_operand.vmem [shape: f32[3,128], index: 8, kind: input, shape index: {}]   ;;  %s3229_s9 = inlined_call_operand.vmem [shape: f32[3,128], index: 9, kind: input, shape index: {}]   ;;  %s3230_s10 = inlined_call_operand.hbm [shape: f32[32,32], index: 10, kind: output, shape index: {}]  }
   0x1   :  { %16 = vsyncpa [#allocation6], 0 }
   0x2   :  { %17 = vsyncpa [#allocation9], 0 }
   0x3   :  { %18 = vsyncpa [#allocation4], 0  ;;  %s2807_s13 = smov [#allocation5]   ;;  %s2667_s17 = scalar_lea.hbm %s3223_s3, 2048 }
   0x4   :  { %s40_s14 = sshll.u32 %s2807_s13, 4  ;;  %p2668_p0 = scmp.ne.s32.totalorder %s3223_s3, %s2667_s17  ;;  %s41_s14 = int_to_ptr.vmem [resolvable:$true] %s40_s14 }
   0x5   :  { %p2671_p1 = scmp.lt.u32.totalorder %s2667_s17, %s3223_s3 }
   0x7   :  { %p2673_p2 = pnand %p2671_p1, %p2668_p0 }
   0x9   :  { %2676 = shalt.err (!%p2673_p2)
}
   0xa   :  { %s2677_s22 = scalar_lea.vmem %s41_s14, 2048  ;;  %p2682_p4 = scmp.lt.s32.totalorder %s41_s14, %s41_s14 }
   0xb   :  { %p2678_p3 = scmp.ne.s32.totalorder %s41_s14, %s2677_s22  ;;  %p2683_p5 = scmp.lt.s32.totalorder %s2677_s22, %s2677_s22 }
   0xd   :  { %p2684_p6 = por %p2683_p5, %p2682_p4 }
   0xf   :  { %p2685_p7 = pnand %p2684_p6, %p2678_p3 }
  0x11   :  { %2688 = shalt.err (!%p2685_p7)
}
  0x12   :  { %s2808_s23 = smov 128   ;;  %s2809_s24 = smov 8  }
  0x13   :  { %46 = dma.hbm_to_vmem [thread:$0]  %s3223_s3, 2048, %s41_s14, [#allocation6], %s2808_s23, %s2808_s23, %s2809_s24  }
  0x14   :  { %s2810_s27 = smov [#allocation8]   ;;  %s2811_s29 = smov [#allocation2]  }
  0x15   :  { %s64_s28 = sshll.u32 %s2810_s27, 4  ;;  %s24_s30 = sshll.u32 %s2811_s29, 4  ;;  %s65_s28 = int_to_ptr.vmem [resolvable:$true] %s64_s28  ;;  %s25_s30 = int_to_ptr.vmem [resolvable:$true] %s24_s30 }
  0x16   :  { %s2689_s13 = scalar_lea.hbm %s3225_s5, 4096 }
  0x17   :  { %p2690_p8 = scmp.ne.s32.totalorder %s3225_s5, %s2689_s13  ;;  %p2693_p9 = scmp.lt.u32.totalorder %s2689_s13, %s3225_s5 }
  0x19   :  { %p2695_p10 = pnand %p2693_p9, %p2690_p8 }
  0x1b   :  { %2698 = shalt.err (!%p2695_p10)
}
  0x1c   :  { %s2699_s3 = scalar_lea.vmem %s65_s28, 4096  ;;  %p2704_p12 = scmp.lt.s32.totalorder %s65_s28, %s65_s28 }
  0x1d   :  { %p2700_p11 = scmp.ne.s32.totalorder %s65_s28, %s2699_s3  ;;  %p2705_p13 = scmp.lt.s32.totalorder %s2699_s3, %s2699_s3 }
  0x1f   :  { %p2706_p0 = por %p2705_p13, %p2704_p12 }
  0x21   :  { %p2707_p1 = pnand %p2706_p0, %p2700_p11 }
  0x23   :  { %2710 = shalt.err (!%p2707_p1)
}
  0x24   :  { %70 = dma.hbm_to_vmem [thread:$0]  %s3225_s5, 4096, %s65_s28, [#allocation9], %s2808_s23, %s2808_s23, %s2809_s24  }
  0x25   :  { %s2711_s22 = scalar_lea.hbm %s3220_s0, 1024 }
  0x26   :  { %p2712_p2 = scmp.ne.s32.totalorder %s3220_s0, %s2711_s22  ;;  %p2715_p3 = scmp.lt.u32.totalorder %s2711_s22, %s3220_s0 }
  0x28   :  { %p2717_p4 = pnand %p2715_p3, %p2712_p2 }
  0x2a   :  { %2720 = shalt.err (!%p2717_p4)
}
  0x2b   :  { %s2721_s11 = scalar_lea.vmem %s25_s30, 1024  ;;  %p2726_p6 = scmp.lt.s32.totalorder %s25_s30, %s25_s30 }
  0x2c   :  { %p2722_p5 = scmp.ne.s32.totalorder %s25_s30, %s2721_s11  ;;  %p2727_p7 = scmp.lt.s32.totalorder %s2721_s11, %s2721_s11 }
  0x2e   :  { %p2728_p8 = por %p2727_p7, %p2726_p6 }
  0x30   :  { %p2729_p9 = pnand %p2728_p8, %p2722_p5 }
  0x32   :  { %2732 = shalt.err (!%p2729_p9)
}
  0x33   :  { %s2812_s5 = smov 256   ;;  %s2813_s28 = smov 16  }
  0x34   :  { %30 = dma.hbm_to_vmem [thread:$0]  %s3220_s0, 1024, %s25_s30, [#allocation3], %s2812_s5, %s2812_s5, %s2813_s28  }
  0x35   :  { %s2814_s15 = smov [#allocation7]   ;;  %s2815_s17 = smov [#allocation10]  }
  0x36   :  { %s52_s16 = sshll.u32 %s2814_s15, 4  ;;  %s76_s18 = sshll.u32 %s2815_s17, 4  ;;  %s53_s16 = int_to_ptr.vmem [resolvable:$true] %s52_s16  ;;  %s77_s18 = int_to_ptr.vmem [resolvable:$true] %s76_s18 }
  0x37   :  { %s2733_s19 = scalar_lea.hbm %s3224_s4, 4096 }
  0x38   :  { %p2734_p10 = scmp.ne.s32.totalorder %s3224_s4, %s2733_s19  ;;  %p2737_p11 = scmp.lt.u32.totalorder %s2733_s19, %s3224_s4 }
  0x3a   :  { %p2739_p12 = pnand %p2737_p11, %p2734_p10 }
  0x3c   :  { %2742 = shalt.err (!%p2739_p12)
}
  0x3d   :  { %s2743_s0 = scalar_lea.vmem %s53_s16, 4096  ;;  %p2748_p0 = scmp.lt.s32.totalorder %s53_s16, %s53_s16 }
  0x3e   :  { %p2744_p13 = scmp.ne.s32.totalorder %s53_s16, %s2743_s0  ;;  %p2749_p1 = scmp.lt.s32.totalorder %s2743_s0, %s2743_s0 }
  0x40   :  { %p2750_p2 = por %p2749_p1, %p2748_p0 }
  0x42   :  { %p2751_p3 = pnand %p2750_p2, %p2744_p13 }
  0x44   :  { %2754 = shalt.err (!%p2751_p3)
}
  0x45   :  { %58 = dma.hbm_to_vmem [thread:$0]  %s3224_s4, 4096, %s53_s16, [#allocation6], %s2808_s23, %s2808_s23, %s2809_s24  }
  0x46   :  { %s2755_s11 = scalar_lea.hbm %s3226_s6, 4096 }
  0x47   :  { %p2756_p4 = scmp.ne.s32.totalorder %s3226_s6, %s2755_s11  ;;  %p2759_p5 = scmp.lt.u32.totalorder %s2755_s11, %s3226_s6 }
  0x49   :  { %p2761_p6 = pnand %p2759_p5, %p2756_p4 }
  0x4b   :  { %2764 = shalt.err (!%p2761_p6)
}
  0x4c   :  { %s2765_s17 = scalar_lea.vmem %s77_s18, 4096  ;;  %p2770_p8 = scmp.lt.s32.totalorder %s77_s18, %s77_s18 }
  0x4d   :  { %p2766_p7 = scmp.ne.s32.totalorder %s77_s18, %s2765_s17  ;;  %p2771_p9 = scmp.lt.s32.totalorder %s2765_s17, %s2765_s17 }
  0x4f   :  { %p2772_p10 = por %p2771_p9, %p2770_p8 }
  0x51   :  { %p2773_p11 = pnand %p2772_p10, %p2766_p7 }
  0x53   :  { %2776 = shalt.err (!%p2773_p11)
}
  0x54   :  { %82 = dma.hbm_to_vmem [thread:$0]  %s3226_s6, 4096, %s77_s18, [#allocation9], %s2808_s23, %s2808_s23, %s2809_s24  }
  0x55   :  { %2799 = dma.done.wait [#allocation3], 1024  }
  0x56   :  { %2800 = vsyncadd [#allocation3], 4294966272 }
  0x57   :  { %2801 = dma.done.wait [#allocation6], 6144  }
  0x58   :  { %2802 = vsyncadd [#allocation6], 4294961152 }
  0x59   :  { %2803 = dma.done.wait [#allocation9], 8192  }
  0x5a   :  { %2804 = vsyncadd [#allocation9], 4294959104  ;;  %v231_v0 = vld [vmem:[#allocation7 + $0x80] sm:$0xff]  ;;  %v232_v1 = vld [vmem:[#allocation7 + $0x88] sm:$0xff]  ;;  %vm109_vm0 = vcmask 64512   ;;  %s2816_s11 = smov 32  }
  0x5b   :  { %v215_v2 = vld [vmem:[#allocation7] sm:$0xff]  ;;  %v2195_v3 = vpack.c.bf16 %v232_v1, %v231_v0  ;;  %v216_v4 = vld [vmem:[#allocation7 + $0x8] sm:$0xff]  ;;  %v233_v5 = vld [vmem:[#allocation7 + $0x90] sm:$0xff]  ;;  %s2817_s5 = smov 64   ;;  %vm1521_vm1 = vcmask 261120  }
  0x5c   :  { %v234_v6 = vld [vmem:[#allocation7 + $0x98] sm:$0xff]  ;;  %v2197_v7 = vpack.c.bf16 %v216_v4, %v215_v2  ;;  %v217_v9 = vld [vmem:[#allocation7 + $0x10] sm:$0xff]  ;;  %v235_v11 = vld [vmem:[#allocation7 + $0xa0] sm:$0xff] }
  0x5d   :  { %v2199_v8 = vpack.c.bf16 %v234_v6, %v233_v5  ;;  %v218_v10 = vld [vmem:[#allocation7 + $0x18] sm:$0xff]  ;;  %2196 = vmatprep.subr.bf16.mxu1 %v2195_v3  ;;  %v236_v12 = vld [vmem:[#allocation7 + $0xa8] sm:$0xff]  ;;  %v219_v15 = vld [vmem:[#allocation7 + $0x20] sm:$0xff] }
  0x5e   :  { %2198 = vmatpush3.bf16.msra.mxu1 %v2197_v7  ;;  %v2201_v13 = vpack.c.bf16 %v218_v10, %v217_v9  ;;  %v2203_v14 = vpack.c.bf16 %v236_v12, %v235_v11  ;;  %v220_v16 = vld [vmem:[#allocation7 + $0x28] sm:$0xff]  ;;  %v237_v17 = vld [vmem:[#allocation7 + $0xb0] sm:$0xff]  ;;  %v238_v18 = vld [vmem:[#allocation7 + $0xb8] sm:$0xff] }
  0x5f   :  { %2200 = vmatprep.subr.bf16.mxu1 %v2199_v8  ;;  %v2205_v19 = vpack.c.bf16 %v220_v16, %v219_v15  ;;  %v2207_v20 = vpack.c.bf16 %v238_v18, %v237_v17  ;;  %v221_v21 = vld [vmem:[#allocation7 + $0x30] sm:$0xff]  ;;  %v222_v22 = vld [vmem:[#allocation7 + $0x38] sm:$0xff]  ;;  %v239_v23 = vld [vmem:[#allocation7 + $0xc0] sm:$0xff] }
  0x60   :  { %v240_v24 = vld [vmem:[#allocation7 + $0xc8] sm:$0xff]  ;;  %v2209_v26 = vpack.c.bf16 %v222_v22, %v221_v21  ;;  %v223_v27 = vld [vmem:[#allocation7 + $0x40] sm:$0xff]  ;;  %v241_v29 = vld [vmem:[#allocation7 + $0xd0] sm:$0xff] }
  0x61   :  { %v208_v25 = vld [vmem:[#allocation2 + $0x8] sm:$0xff]  ;;  %v2211_v30 = vpack.c.bf16 %v240_v24, %v239_v23  ;;  %v242_v31 = vld [vmem:[#allocation7 + $0xd8] sm:$0xff]  ;;  %v108_v32 = vld [vmem:[%s3222_s2] sm:$0xff] }
  0x62   :  { %2202 = vmatpush3.bf16.msra.mxu1 %v2201_v13  ;;  %316 = vmatprep.mubr.f32.mxu1 %v208_v25  ;;  %v224_v28 = vld [vmem:[#allocation7 + $0x48] sm:$0xff]  ;;  %v104_v33 = vld [vmem:[%s3221_s1] sm:$0xff]  ;;  %v339_v38 = vld [vmem:[#allocation5 + $0x10] sm:$0xff]  ;;  %v2215_v44 = vpack.c.bf16 %v242_v31, %v241_v29 }
  0x63   :  { %2204 = vmatprep.subr.bf16.mxu1 %v2203_v14  ;;  %1807 = vmatprep.subr.mxu0 %v108_v32  ;;  %v105_v34 = vld [vmem:[%s3221_s1 + $0x8] sm:$0xff]  ;;  %v337_v35 = vld [vmem:[#allocation5] sm:$0xff]  ;;  %v340_v39 = vld [vmem:[#allocation5 + $0x18] sm:$0xff]  ;;  %v2213_v40 = vpack.c.bf16 %v224_v28, %v223_v27 }
  0x64   :  { %1809 = vmatprep.mubr.msk.f32.mxu0 %vm109_vm0, %v104_v33  ;;  %v338_v36 = vld [vmem:[#allocation5 + $0x8] sm:$0xff]  ;;  %1808 = vmatpush3.msra.mxu0 %v108_v32  ;;  %v2960_v41 = vpack.c.bf16 %v340_v39, %v339_v38  ;;  %v341_v42 = vld [vmem:[#allocation5 + $0x20] sm:$0xff]  ;;  %v225_v45 = vld [vmem:[#allocation7 + $0x50] sm:$0xff] }
  0x65   :  { %v2957_v37 = vpack.c.bf16 %v338_v36, %v337_v35  ;;  %1810 = vmatmul.mubr.msk.f32.vlgmr.msra.gmra.mrb[0].mxu0 %vm109_vm0, %v105_v34  ;;  %v342_v43 = vld [vmem:[#allocation5 + $0x28] sm:$0xff]  ;;  %v226_v46 = vld [vmem:[#allocation7 + $0x58] sm:$0xff]  ;;  %v243_v47 = vld [vmem:[#allocation7 + $0xe0] sm:$0xff] }
  0x66   :  { %2206 = vmatpush3.bf16.msra.mxu1 %v2205_v19  ;;  %v244_v48 = vld [vmem:[#allocation7 + $0xe8] sm:$0xff]  ;;  %v2965_v49 = vpack.c.bf16 %v342_v43, %v341_v42  ;;  %v2217_v50 = vpack.c.bf16 %v226_v46, %v225_v45  ;;  %v343_v51 = vld [vmem:[#allocation5 + $0x30] sm:$0xff]  ;;  %v344_v52 = vld [vmem:[#allocation5 + $0x38] sm:$0xff] }
  0x67   :  { %2208 = vmatprep.subr.bf16.mxu1 %v2207_v20  ;;  %2228 = vmatprep.subr.bf16.mxu0 %v2957_v37  ;;  %v2219_v53 = vpack.c.bf16 %v244_v48, %v243_v47  ;;  %v227_v54 = vld [vmem:[#allocation7 + $0x60] sm:$0xff]  ;;  %v228_v55 = vld [vmem:[#allocation7 + $0x68] sm:$0xff]  ;;  %v245_v56 = vld [vmem:[#allocation7 + $0xf0] sm:$0xff]  ;;  %v2969_v58 = vpack.c.bf16 %v344_v52, %v343_v51 }
  0x68   :  { %2230 = vmatpush3.bf16.msra.mxu0 %v2957_v37  ;;  %v246_v57 = vld [vmem:[#allocation7 + $0xf8] sm:$0xff]  ;;  %v2221_v59 = vpack.c.bf16 %v228_v55, %v227_v54  ;;  %v345_v60 = vld [vmem:[#allocation5 + $0x40] sm:$0xff]  ;;  %v346_v61 = vld [vmem:[#allocation5 + $0x48] sm:$0xff] }
  0x69   :  { %2232 = vmatprep.subr.bf16.mxu0 %v2960_v41  ;;  %v2223_v62 = vpack.c.bf16 %v246_v57, %v245_v56  ;;  %v229_v63 = vld [vmem:[#allocation7 + $0x70] sm:$0xff]  ;;  %v230_v0 = vld [vmem:[#allocation7 + $0x78] sm:$0xff]  ;;  %v2973_v1 = vpack.c.bf16 %v346_v61, %v345_v60  ;;  %v207_v6 = vld [vmem:[#allocation2] sm:$0xff] }
  0x6a   :  { %2210 = vmatpush3.bf16.msra.mxu1 %v2209_v26  ;;  %v2225_v2 = vpack.c.bf16 %v230_v0, %v229_v63  ;;  %v347_v3 = vld [vmem:[#allocation5 + $0x50] sm:$0xff]  ;;  %v348_v4 = vld [vmem:[#allocation5 + $0x58] sm:$0xff]  ;;  %v212_v9 = vld [vmem:[#allocation2 + $0x28] sm:$0xff] }
  0x6b   :  { %2212 = vmatprep.subr.bf16.mxu1 %v2211_v30  ;;  %v2977_v5 = vpack.c.bf16 %v348_v4, %v347_v3  ;;  %v210_v7 = vld [vmem:[#allocation2 + $0x18] sm:$0xff]  ;;  %v209_v8 = vld [vmem:[#allocation2 + $0x10] sm:$0xff]  ;;  %v211_v10 = vld [vmem:[#allocation2 + $0x20] sm:$0xff] }
  0x6c   :  { %2234 = vmatpush3.bf16.msra.mxu0 %v2960_v41  ;;  %v214_v11 = vld [vmem:[#allocation2 + $0x38] sm:$0xff]  ;;  %v213_v12 = vld [vmem:[#allocation2 + $0x30] sm:$0xff]  ;;  %v349_v13 = vld [vmem:[#allocation5 + $0x60] sm:$0xff] }
  0x6d   :  { %2236 = vmatprep.subr.bf16.mxu0 %v2965_v49  ;;  %v350_v14 = vld [vmem:[#allocation5 + $0x68] sm:$0xff]  ;;  %v106_v16 = vld [vmem:[%s3221_s1 + $0x10] sm:$0xff]  ;;  %v352_v18 = vld [vmem:[#allocation5 + $0x78] sm:$0xff] }
  0x6e   :  { %2214 = vmatpush3.bf16.msra.mxu1 %v2213_v40  ;;  %v2994_v15 = vpack.c.bf16 %v350_v14, %v349_v13  ;;  %v351_v17 = vld [vmem:[#allocation5 + $0x70] sm:$0xff]  ;;  %1812 = vmatprep.mubr.msk.f32.mxu0 %vm109_vm0, %v106_v16  ;;  %v107_v19 = vld [vmem:[%s3221_s1 + $0x18] sm:$0xff]  ;;  %v1549_v24 = vld [vmem:[%s3227_s7] ss:$0 sm:$0xff] }
  0x6f   :  { %2216 = vmatprep.subr.bf16.mxu1 %v2215_v44  ;;  %v3007_v20 = vpack.c.bf16 %v352_v18, %v351_v17  ;;  %1813 = vmatmul.mubr.msk.f32.gmra.mrb[2].mxu0 %vm109_vm0, %v107_v19  ;;  %v1550_v4 = vld [vmem:[%s3228_s8] ss:$0 sm:$0xff] }
  0x70   :  { %2238 = vmatpush3.bf16.msra.mxu0 %v2965_v49 }
  0x71   :  { %2240 = vmatprep.subr.bf16.mxu0 %v2969_v58 }
  0x72   :  { %2218 = vmatpush3.bf16.msra.mxu1 %v2217_v50 }
  0x73   :  { %2220 = vmatprep.subr.bf16.mxu1 %v2219_v53 }
  0x74   :  { %2242 = vmatpush3.bf16.msra.mxu0 %v2969_v58 }
  0x75   :  { %2244 = vmatprep.subr.bf16.mxu0 %v2973_v1 }
  0x76   :  { %2222 = vmatpush3.bf16.msra.mxu1 %v2221_v59 }
  0x77   :  { %2224 = vmatprep.subr.bf16.mxu1 %v2223_v62 }
  0x78   :  { %2246 = vmatpush3.bf16.msra.mxu0 %v2973_v1 }
  0x79   :  { %2248 = vmatprep.subr.bf16.mxu0 %v2977_v5 }
  0x7a   :  { %2226 = vmatpush3.bf16.msra.mxu1 %v2225_v2 }
  0x7b   :  { %2260 = vmatprep.subr.bf16.mxu1 %v2957_v37 }
  0x7c   :  { %2250 = vmatpush3.bf16.msra.mxu0 %v2977_v5 }
  0x7d   :  { %317 = vmatmul.mubr.f32.vlgmr.msra.gmra.mrb[0].mxu1 %v207_v6  ;;  %2252 = vmatprep.subr.bf16.mxu0 %v2994_v15 }
  0x7e   :  { %321 = vmatprep.mubr.f32.mxu1 %v210_v7  ;;  %2262 = vmatpush3.bf16.msra.mxu1 %v2957_v37 }
  0x7f   :  { %2264 = vmatprep.subr.bf16.mxu1 %v2960_v41 }
  0x80   :  { %2254 = vmatpush3.bf16.msra.mxu0 %v2994_v15 }
  0x81   :  { %322 = vmatmul.mubr.f32.gmra.mrb[2].mxu1 %v209_v8  ;;  %2256 = vmatprep.subr.bf16.mxu0 %v3007_v20 }
  0x82   :  { %326 = vmatprep.mubr.f32.mxu1 %v212_v9  ;;  %2266 = vmatpush3.bf16.msra.mxu1 %v2960_v41  ;;  %v1551_v9 = vld [vmem:[%s3229_s9] ss:$0 sm:$0xff] }
  0x83   :  { %2268 = vmatprep.subr.bf16.mxu1 %v2965_v49 }
  0x84   :  { %2258 = vmatpush3.bf16.msra.mxu0 %v3007_v20 }
  0x85   :  { %327 = vmatmul.mubr.f32.gmra.mrb[4].mxu1 %v211_v10 }
  0x86   :  { %331 = vmatprep.mubr.f32.mxu1 %v214_v11  ;;  %2270 = vmatpush3.bf16.msra.mxu1 %v2965_v49 }
  0x87   :  { %2272 = vmatprep.subr.bf16.mxu1 %v2969_v58 }
  0x89   :  { %332 = vmatmul.mubr.f32.gmra.mrb[6].mxu1 %v213_v12 }
  0x8a   :  { %2274 = vmatpush3.bf16.msra.mxu1 %v2969_v58 }
  0x8b   :  { %2276 = vmatprep.subr.bf16.mxu1 %v2973_v1 }
  0x8e   :  { %2278 = vmatpush3.bf16.msra.mxu1 %v2973_v1 }
  0x8f   :  { %2280 = vmatprep.subr.bf16.mxu1 %v2977_v5 }
  0x92   :  { %2282 = vmatpush3.bf16.msra.mxu1 %v2977_v5 }
  0x93   :  { %2284 = vmatprep.subr.bf16.mxu1 %v2994_v15 }
  0x96   :  { %2286 = vmatpush3.bf16.msra.mxu1 %v2994_v15 }
  0x97   :  { %2288 = vmatprep.subr.bf16.mxu1 %v3007_v20 }
  0x9a   :  { %2290 = vmatpush3.bf16.msra.mxu1 %v3007_v20 }
  0x9b   :  { %2356 = vmatprep.subr.bf16.mxu1 %v2957_v37 }
 0x138   :  { %v3015_v21 = vpop.f32.mrb[0].mxu0 }
 0x139   :  { %v3017_v22 = vpop.f32.mrb[1].mxu0 }
 0x142   :  { %v3022_v42 = vpop.f32.mrb[2].mxu0 }
 0x143   :  { %v3024_v43 = vpop.f32.mrb[3].mxu0 }
 0x150   :  { %v1595_v23 = vpop.f32.mrb[0].mxu1 }
 0x151   :  { %v1596_v25 = vpop.f32.mrb[1].mxu1 }
 0x152   :  { %v1597_v26 = vadd.f32 %v1596_v25, %v1595_v23 }
 0x154   :  { %v319_v27 = vadd.f32 %v1597_v26, %v1549_v24  ;;  %v1598_v28 = vpop.f32.mrb[2].mxu1 }
 0x155   :  { %v1599_v29 = vpop.f32.mrb[3].mxu1 }
 0x156   :  { %v1600_v30 = vadd.f32 %v1599_v29, %v1598_v28  ;;  %1847 = vmatprep.mubr.f32.mxu0 %v319_v27 }
 0x158   :  { %v324_v31 = vadd.f32 %v1600_v30, %v1549_v24  ;;  %v1601_v32 = vpop.f32.mrb[4].mxu1 }
 0x159   :  { %v1602_v33 = vpop.f32.mrb[5].mxu1 }
 0x15a   :  { %1848 = vmatmul.mubr.f32.vlgmr.msra.gmra.mrb[4].mxu0 %v324_v31  ;;  %v1603_v34 = vadd.f32 %v1602_v33, %v1601_v32 }
 0x15c   :  { %v329_v35 = vadd.f32 %v1603_v34, %v1549_v24  ;;  %v1604_v36 = vpop.f32.mrb[6].mxu1 }
 0x15d   :  { %v1605_v38 = vpop.f32.mrb[7].mxu1 }
 0x15e   :  { %v1606_v39 = vadd.f32 %v1605_v38, %v1604_v36  ;;  %1850 = vmatprep.mubr.f32.mxu0 %v329_v35 }
 0x160   :  { %v334_v40 = vadd.f32 %v1606_v39, %v1549_v24 }
 0x162   :  { %1851 = vmatmul.mubr.f32.gmra.mrb[6].mxu0 %v334_v40 }
 0x22d   :  { %v1849_v44 = vpop.f32.mrb[4].mxu0 }
 0x22e   :  { %v439_v45 = vsub.f32 %v324_v31, %v1849_v44  ;;  %v419_v46 = vpop.f32.mrb[5].mxu0 }
 0x22f   :  { %v438_v47 = vsub.f32 %v319_v27, %v419_v46 }
 0x230   :  { %v443_v50 = vmul.f32 %v439_v45, %v439_v45 }
 0x231   :  { %v442_v48 = vmul.f32 %v438_v47, %v438_v47 }
 0x233   :  { %1885 = vmatprep.mubr.f32.mxu1 %v442_v48  ;;  %v618_v48 = vld [vmem:[#allocation10 + $0x8] sm:$0xff] }
 0x234   :  { %1886 = vmatmul.mubr.f32.vlgmr.msra.gmra.mrb[8].mxu1 %v443_v50  ;;  %v619_v50 = vld [vmem:[#allocation10 + $0x10] sm:$0xff] }
 0x235   :  { %v1852_v51 = vpop.f32.mrb[6].mxu0  ;;  %2358 = vmatpush3.bf16.msra.mxu1 %v2957_v37 }
 0x236   :  { %v441_v52 = vsub.f32 %v334_v40, %v1852_v51  ;;  %v429_v53 = vpop.f32.mrb[7].mxu0  ;;  %2360 = vmatprep.subr.bf16.mxu1 %v2960_v41 }
 0x237   :  { %v440_v54 = vsub.f32 %v329_v35, %v429_v53 }
 0x238   :  { %v445_v56 = vmul.f32 %v441_v52, %v441_v52 }
 0x239   :  { %v444_v55 = vmul.f32 %v440_v54, %v440_v54  ;;  %2362 = vmatpush3.bf16.msra.mxu1 %v2960_v41 }
 0x23a   :  { %2364 = vmatprep.subr.bf16.mxu1 %v2965_v49 }
 0x23b   :  { %1888 = vmatprep.mubr.f32.mxu1 %v444_v55 }
 0x23c   :  { %1889 = vmatmul.mubr.f32.gmra.mrb[10].mxu1 %v445_v56  ;;  %v621_v56 = vld [vmem:[#allocation10 + $0x20] sm:$0xff] }
 0x23d   :  { %2366 = vmatpush3.bf16.msra.mxu1 %v2965_v49 }
 0x23e   :  { %2368 = vmatprep.subr.bf16.mxu1 %v2969_v58 }
 0x241   :  { %2370 = vmatpush3.bf16.msra.mxu1 %v2969_v58 }
 0x242   :  { %2372 = vmatprep.subr.bf16.mxu1 %v2973_v1 }
 0x245   :  { %2374 = vmatpush3.bf16.msra.mxu1 %v2973_v1 }
 0x246   :  { %2376 = vmatprep.subr.bf16.mxu1 %v2977_v5 }
 0x249   :  { %2378 = vmatpush3.bf16.msra.mxu1 %v2977_v5 }
 0x24a   :  { %2380 = vmatprep.subr.bf16.mxu1 %v2994_v15 }
 0x24d   :  { %2382 = vmatpush3.bf16.msra.mxu1 %v2994_v15 }
 0x24e   :  { %2384 = vmatprep.subr.bf16.mxu1 %v3007_v20 }
 0x251   :  { %2386 = vmatpush3.bf16.msra.mxu1 %v3007_v20 }
 0x252   :  { %2388 = vmatprep.subr.bf16.mxu1 %v2957_v37 }
 0x307   :  { %v1887_v57 = vpop.f32.mrb[8].mxu1 }
 0x308   :  { %v518_v59 = vadd.f32 1e-05, %v1887_v57  ;;  %v512_v60 = vpop.f32.mrb[9].mxu1  ;;  %v622_v57 = vld [vmem:[#allocation10 + $0x28] sm:$0xff] }
 0x309   :  { %v513_v61 = vadd.f32 1e-05, %v512_v60 }
 0x30a   :  { %2643 = vrsqrt.f32 %v518_v59 }
 0x30b   :  { %2645 = vrsqrt.f32 %v513_v61 }
 0x30f   :  { %v1890_v62 = vpop.f32.mrb[10].mxu1 }
 0x310   :  { %v528_v63 = vadd.f32 1e-05, %v1890_v62  ;;  %v522_v0 = vpop.f32.mrb[11].mxu1  ;;  %v2299_v62 = vpack.c.bf16 %v622_v57, %v621_v56 }
 0x311   :  { %v523_v2 = vadd.f32 1e-05, %v522_v0  ;;  %v624_v0 = vld [vmem:[#allocation10 + $0x38] sm:$0xff] }
 0x312   :  { %2647 = vrsqrt.f32 %v528_v63  ;;  %v623_v63 = vld [vmem:[#allocation10 + $0x30] sm:$0xff] }
 0x313   :  { %2649 = vrsqrt.f32 %v523_v2  ;;  %v2303_v2 = vpack.c.bf16 %v624_v0, %v623_v63  ;;  %v609_v0 = vld [vmem:[#allocation8 + $0x40] sm:$0xff] }
 0x314   :  { %v2644_v3 = vpop.eup %2643 }
 0x315   :  { %v2646_v6 = vpop.eup %2645  ;;  %v536_v7 = vmul.f32 %v2644_v3, %v439_v45  ;;  %v625_v3 = vld [vmem:[#allocation10 + $0x40] sm:$0xff] }
 0x316   :  { %v535_v8 = vmul.f32 %v2646_v6, %v438_v47  ;;  %v617_v47 = vld [vmem:[#allocation10] sm:$0xff] }
 0x317   :  { %v545_v10 = vmul.f32 %v1550_v4, %v536_v7  ;;  %v2291_v53 = vpack.c.bf16 %v618_v48, %v617_v47  ;;  %v627_v7 = vld [vmem:[#allocation10 + $0x50] sm:$0xff] }
 0x318   :  { %v544_v11 = vmul.f32 %v1550_v4, %v535_v8  ;;  %v628_v8 = vld [vmem:[#allocation10 + $0x58] sm:$0xff]  ;;  %v603_v48 = vld [vmem:[#allocation8 + $0x10] sm:$0xff] }
 0x319   :  { %v554_v12 = vadd.f32 %v1551_v9, %v545_v10  ;;  %2292 = vmatprep.subr.bf16.mxu0 %v2291_v53  ;;  %v629_v10 = vld [vmem:[#allocation10 + $0x60] sm:$0xff] }
 0x31a   :  { %v553_v13 = vadd.f32 %v1551_v9, %v544_v11  ;;  %2294 = vmatpush3.bf16.msra.mxu0 %v2291_v53  ;;  %v630_v11 = vld [vmem:[#allocation10 + $0x68] sm:$0xff] }
 0x31b   :  { %v558_v14 = vmax.f32 %v554_v12, 0.0  ;;  %v2315_v12 = vpack.c.bf16 %v630_v11, %v629_v10  ;;  %v606_v53 = vld [vmem:[#allocation8 + $0x28] sm:$0xff]  ;;  %v615_v11 = vld [vmem:[#allocation8 + $0x70] sm:$0xff] }
 0x31c   :  { %v2648_v16 = vpop.eup %2647  ;;  %v557_v17 = vmax.f32 %v553_v13, 0.0  ;;  %v631_v13 = vld [vmem:[#allocation10 + $0x70] sm:$0xff] }
 0x31d   :  { %v2650_v18 = vpop.eup %2649  ;;  %v538_v19 = vmul.f32 %v2648_v16, %v441_v52  ;;  %v3049_v23 = vmul.f32 %v3015_v21, %v558_v14  ;;  %v632_v14 = vld [vmem:[#allocation10 + $0x78] sm:$0xff] }
 0x31e   :  { %v537_v24 = vmul.f32 %v2650_v18, %v440_v54  ;;  %v3052_v25 = vmul.f32 %v557_v17, %v3017_v22  ;;  %v620_v54 = vld [vmem:[#allocation10 + $0x18] sm:$0xff]  ;;  %v2319_v16 = vpack.c.bf16 %v632_v14, %v631_v13  ;;  %v601_v17 = vld [vmem:[#allocation8] sm:$0xff]  ;;  %v602_v18 = vld [vmem:[#allocation8 + $0x8] sm:$0xff] }
 0x31f   :  { %v547_v26 = vmul.f32 %v1550_v4, %v538_v19  ;;  %v2295_v55 = vpack.c.bf16 %v620_v54, %v619_v50  ;;  %v2323_v19 = vpack.c.bf16 %v602_v18, %v601_v17  ;;  %v604_v50 = vld [vmem:[#allocation8 + $0x18] sm:$0xff] }
 0x320   :  { %v2583_v27 = vpack.i.bf16 %v3049_v23, %v3052_v25  ;;  %v546_v28 = vmul.f32 %v1550_v4, %v537_v24  ;;  %v626_v4 = vld [vmem:[#allocation10 + $0x48] sm:$0xff] }
 0x321   :  { %v556_v29 = vadd.f32 %v1551_v9, %v547_v26  ;;  %2296 = vmatprep.subr.bf16.mxu0 %v2295_v55  ;;  %v2307_v6 = vpack.c.bf16 %v626_v4, %v625_v3  ;;  %v611_v4 = vld [vmem:[#allocation8 + $0x50] sm:$0xff] }
 0x322   :  { %2584 = vrot.lane.b32.xlu0 %v2583_v27, %s2813_s28  ;;  %v555_v30 = vadd.f32 %v1551_v9, %v546_v28  ;;  %2298 = vmatpush3.bf16.msra.mxu0 %v2295_v55  ;;  %v2311_v9 = vpack.c.bf16 %v628_v8, %v627_v7  ;;  %v613_v8 = vld [vmem:[#allocation8 + $0x60] sm:$0xff] }
 0x323   :  { %v560_v31 = vmax.f32 %v556_v29, 0.0  ;;  %2300 = vmatprep.subr.bf16.mxu0 %v2299_v62 }
 0x324   :  { %v559_v32 = vmax.f32 %v555_v30, 0.0 }
 0x325   :  { %v3058_v33 = vmul.f32 %v3022_v42, %v560_v31 }
 0x326   :  { %v3061_v34 = vmul.f32 %v559_v32, %v3024_v43  ;;  %2302 = vmatpush3.bf16.msra.mxu0 %v2299_v62 }
 0x327   :  { %2304 = vmatprep.subr.bf16.mxu0 %v2303_v2 }
 0x328   :  { %v2588_v35 = vpack.i.bf16 %v3058_v33, %v3061_v34 }
 0x32a   :  { %2589 = vrot.lane.b32.xlu0 %v2588_v35, %s2813_s28  ;;  %2306 = vmatpush3.bf16.msra.mxu0 %v2303_v2  ;;  %v610_v2 = vld [vmem:[#allocation8 + $0x48] sm:$0xff] }
 0x32b   :  { %2308 = vmatprep.subr.bf16.mxu0 %v2307_v6  ;;  %v2339_v3 = vpack.c.bf16 %v610_v2, %v609_v0 }
 0x32e   :  { %2310 = vmatpush3.bf16.msra.mxu0 %v2307_v6  ;;  %v612_v6 = vld [vmem:[#allocation8 + $0x58] sm:$0xff] }
 0x32f   :  { %2312 = vmatprep.subr.bf16.mxu0 %v2311_v9  ;;  %v2343_v7 = vpack.c.bf16 %v612_v6, %v611_v4 }
 0x332   :  { %2314 = vmatpush3.bf16.msra.mxu0 %v2311_v9  ;;  %v614_v9 = vld [vmem:[#allocation8 + $0x68] sm:$0xff] }
 0x333   :  { %2316 = vmatprep.subr.bf16.mxu0 %v2315_v12  ;;  %v2347_v10 = vpack.c.bf16 %v614_v9, %v613_v8 }
 0x336   :  { %2318 = vmatpush3.bf16.msra.mxu0 %v2315_v12  ;;  %v616_v12 = vld [vmem:[#allocation8 + $0x78] sm:$0xff] }
 0x337   :  { %2320 = vmatprep.subr.bf16.mxu0 %v2319_v16  ;;  %v2351_v13 = vpack.c.bf16 %v616_v12, %v615_v11 }
 0x33a   :  { %2322 = vmatpush3.bf16.msra.mxu0 %v2319_v16 }
 0x33b   :  { %2324 = vmatprep.subr.bf16.mxu0 %v2323_v19 }
 0x394   :  { %v2585_v36 = vpop.permute.xlu0 %2584 }
 0x395   :  { %v2587_v38 = vunpack.i.h.bf16 %v2585_v36  ;;  %v2586_v39 = vunpack.i.l.bf16 %v2585_v36 }
 0x397   :  { %v573_v40 = vmax.f32 %v3052_v25, %v2586_v39  ;;  %v574_v44 = vmax.f32 %v3049_v23, %v2587_v38 }
 0x399   :  { %v2593_v45 = vpack.i.bf16 %v574_v44, %v573_v40 }
 0x39b   :  { %2594 = vrot.lane.b32.xlu1 %v2593_v45, %s2816_s11 }
 0x39c   :  { %v2590_v46 = vpop.permute.xlu0 %2589 }
 0x39d   :  { %v2592_v51 = vunpack.i.h.bf16 %v2590_v46  ;;  %v2591_v52 = vunpack.i.l.bf16 %v2590_v46 }
 0x39f   :  { %v576_v59 = vmax.f32 %v3058_v33, %v2592_v51  ;;  %v575_v60 = vmax.f32 %v3061_v34, %v2591_v52  ;;  %v605_v52 = vld [vmem:[#allocation8 + $0x20] sm:$0xff] }
 0x3a0   :  { %v2331_v55 = vpack.c.bf16 %v606_v53, %v605_v52  ;;  %v1553_v53 = vld [vmem:[%s3228_s8 + $0x1] ss:$0 sm:$0xff] }
 0x3a1   :  { %v2598_v61 = vpack.i.bf16 %v576_v59, %v575_v60 }
 0x3a3   :  { %2599 = vrot.lane.b32.xlu1 %v2598_v61, %s2816_s11 }
 0x40d   :  { %v2595_v24 = vpop.permute.xlu1 %2594 }
 0x40e   :  { %v2597_v26 = vunpack.i.h.bf16 %v2595_v24  ;;  %v2596_v27 = vunpack.i.l.bf16 %v2595_v24 }
 0x410   :  { %v586_v28 = vmax.f32 %v574_v44, %v2597_v26  ;;  %v585_v29 = vmax.f32 %v573_v40, %v2596_v27  ;;  %v2327_v40 = vpack.c.bf16 %v604_v50, %v603_v48 }
 0x412   :  { %v2603_v30 = vpack.i.bf16 %v586_v28, %v585_v29 }
 0x414   :  { %2604 = vrot.lane.b32.xlu0 %v2603_v30, %s2817_s5 }
 0x415   :  { %v2600_v31 = vpop.permute.xlu1 %2599 }
 0x416   :  { %v2602_v32 = vunpack.i.h.bf16 %v2600_v31  ;;  %v2601_v35 = vunpack.i.l.bf16 %v2600_v31 }
 0x418   :  { %v588_v36 = vmax.f32 %v576_v59, %v2602_v32  ;;  %v587_v38 = vmax.f32 %v575_v60, %v2601_v35  ;;  %v607_v59 = vld [vmem:[#allocation8 + $0x30] sm:$0xff]  ;;  %v608_v60 = vld [vmem:[#allocation8 + $0x38] sm:$0xff] }
 0x419   :  { %v2335_v63 = vpack.c.bf16 %v608_v60, %v607_v59 }
 0x41a   :  { %v2608_v39 = vpack.i.bf16 %v588_v36, %v587_v38 }
 0x41c   :  { %2609 = vrot.lane.b32.xlu1 %v2608_v39, %s2817_s5 }
 0x486   :  { %v2605_v45 = vpop.permute.xlu0 %2604 }
 0x487   :  { %v2607_v46 = vunpack.i.h.bf16 %v2605_v45  ;;  %v2606_v47 = vunpack.i.l.bf16 %v2605_v45 }
 0x489   :  { %v598_v51 = vmax.f32 %v586_v28, %v2607_v46  ;;  %v597_v44 = vmax.f32 %v585_v29, %v2606_v47 }
 0x48b   :  { %1923 = vmatprep.mubr.f32.mxu0 %v597_v44 }
 0x48c   :  { %1924 = vmatmul.mubr.f32.vlgmr.msra.gmra.mrb[8].mxu0 %v598_v51 }
 0x48d   :  { %2326 = vmatpush3.bf16.msra.mxu0 %v2323_v19 }
 0x48e   :  { %v2610_v54 = vpop.permute.xlu1 %2609  ;;  %2328 = vmatprep.subr.bf16.mxu0 %v2327_v40 }
 0x48f   :  { %v2612_v56 = vunpack.i.h.bf16 %v2610_v54  ;;  %v2611_v57 = vunpack.i.l.bf16 %v2610_v54 }
 0x491   :  { %v600_v61 = vmax.f32 %v588_v36, %v2612_v56  ;;  %v599_v62 = vmax.f32 %v587_v38, %v2611_v57  ;;  %2330 = vmatpush3.bf16.msra.mxu0 %v2327_v40  ;;  %v1554_v57 = vld [vmem:[%s3229_s9 + $0x1] ss:$0 sm:$0xff] }
 0x492   :  { %2332 = vmatprep.subr.bf16.mxu0 %v2331_v55 }
 0x493   :  { %1926 = vmatprep.mubr.f32.mxu0 %v599_v62 }
 0x494   :  { %1927 = vmatmul.mubr.f32.gmra.mrb[10].mxu0 %v600_v61 }
 0x495   :  { %2334 = vmatpush3.bf16.msra.mxu0 %v2331_v55  ;;  %1961 = vmatprep.mubr.f32.mxu0 %v3052_v25  ;;  %v1552_v25 = vld [vmem:[%s3227_s7 + $0x1] ss:$0 sm:$0xff] }
 0x496   :  { %2336 = vmatprep.subr.bf16.mxu0 %v2335_v63 }
 0x499   :  { %2338 = vmatpush3.bf16.msra.mxu0 %v2335_v63 }
 0x49a   :  { %2340 = vmatprep.subr.bf16.mxu0 %v2339_v3 }
 0x49d   :  { %2342 = vmatpush3.bf16.msra.mxu0 %v2339_v3 }
 0x49e   :  { %2344 = vmatprep.subr.bf16.mxu0 %v2343_v7 }
 0x4a1   :  { %2346 = vmatpush3.bf16.msra.mxu0 %v2343_v7 }
 0x4a2   :  { %2348 = vmatprep.subr.bf16.mxu0 %v2347_v10 }
 0x4a5   :  { %2350 = vmatpush3.bf16.msra.mxu0 %v2347_v10 }
 0x4a6   :  { %2352 = vmatprep.subr.bf16.mxu0 %v2351_v13 }
 0x4a9   :  { %2354 = vmatpush3.bf16.msra.mxu0 %v2351_v13 }
 0x4ac   :  { %1962 = vmatmul.mubr.f32.vlgmr.msra.gmra.mrb[8].mxu0 %v3049_v23 }
 0x4ad   :  { %1964 = vmatprep.mubr.f32.mxu0 %v3061_v34 }
 0x4b0   :  { %1965 = vmatmul.mubr.f32.gmra.mrb[10].mxu0 %v3058_v33 }
 0x57f   :  { %v1963_v14 = vpop.f32.mrb[8].mxu0 }
 0x580   :  { %v784_v16 = vpop.f32.mrb[9].mxu0  ;;  %v809_v18 = vadd.f32 %v1963_v14, %v1552_v25 }
 0x581   :  { %v808_v17 = vadd.f32 %v1552_v25, %v784_v16 }
 0x583   :  { %v1966_v19 = vpop.f32.mrb[10].mxu0  ;;  %1999 = vmatprep.mubr.f32.mxu1 %v808_v17 }
 0x584   :  { %v794_v24 = vpop.f32.mrb[11].mxu0  ;;  %2000 = vmatmul.mubr.f32.vlgmr.msra.gmra.mrb[12].mxu1 %v809_v18  ;;  %v811_v23 = vadd.f32 %v1966_v19, %v1552_v25 }
 0x585   :  { %v810_v26 = vadd.f32 %v1552_v25, %v794_v24  ;;  %2390 = vmatpush3.bf16.msra.mxu1 %v2957_v37 }
 0x586   :  { %2392 = vmatprep.subr.bf16.mxu1 %v2960_v41 }
 0x587   :  { %2002 = vmatprep.mubr.f32.mxu1 %v810_v26 }
 0x588   :  { %2003 = vmatmul.mubr.f32.gmra.mrb[14].mxu1 %v811_v23 }
 0x589   :  { %2394 = vmatpush3.bf16.msra.mxu1 %v2960_v41 }
 0x58a   :  { %2396 = vmatprep.subr.bf16.mxu1 %v2965_v49 }
 0x58d   :  { %2398 = vmatpush3.bf16.msra.mxu1 %v2965_v49 }
 0x58e   :  { %2400 = vmatprep.subr.bf16.mxu1 %v2969_v58 }
 0x591   :  { %2402 = vmatpush3.bf16.msra.mxu1 %v2969_v58 }
 0x592   :  { %2404 = vmatprep.subr.bf16.mxu1 %v2973_v1 }
 0x595   :  { %2406 = vmatpush3.bf16.msra.mxu1 %v2973_v1 }
 0x596   :  { %2408 = vmatprep.subr.bf16.mxu1 %v2977_v5 }
 0x599   :  { %2410 = vmatpush3.bf16.msra.mxu1 %v2977_v5 }
 0x59a   :  { %2412 = vmatprep.subr.bf16.mxu1 %v2994_v15 }
 0x59d   :  { %2414 = vmatpush3.bf16.msra.mxu1 %v2994_v15 }
 0x59e   :  { %2416 = vmatprep.subr.bf16.mxu1 %v3007_v20 }
 0x5a1   :  { %2418 = vmatpush3.bf16.msra.mxu1 %v3007_v20 }
 0x5a2   :  { %2484 = vmatprep.subr.bf16.mxu1 %v2957_v37 }
 0x657   :  { %v2001_v33 = vpop.f32.mrb[12].mxu1 }
 0x658   :  { %v898_v34 = vsub.f32 %v809_v18, %v2001_v33  ;;  %v878_v27 = vpop.f32.mrb[13].mxu1 }
 0x659   :  { %v897_v28 = vsub.f32 %v808_v17, %v878_v27  ;;  %v1078_v27 = vld [vmem:[#allocation10 + $0x80] sm:$0xff] }
 0x65a   :  { %v902_v31 = vmul.f32 %v898_v34, %v898_v34 }
 0x65b   :  { %v901_v29 = vmul.f32 %v897_v28, %v897_v28  ;;  %v2004_v30 = vpop.f32.mrb[14].mxu1 }
 0x65c   :  { %v900_v32 = vsub.f32 %v811_v23, %v2004_v30  ;;  %v888_v35 = vpop.f32.mrb[15].mxu1 }
 0x65d   :  { %v899_v36 = vsub.f32 %v810_v26, %v888_v35  ;;  %2037 = vmatprep.mubr.f32.mxu1 %v901_v29  ;;  %v1080_v29 = vld [vmem:[#allocation10 + $0x90] sm:$0xff] }
 0x65e   :  { %2038 = vmatmul.mubr.f32.vlgmr.msra.gmra.mrb[16].mxu1 %v902_v31  ;;  %v904_v39 = vmul.f32 %v900_v32, %v900_v32 }
 0x65f   :  { %v903_v38 = vmul.f32 %v899_v36, %v899_v36  ;;  %2486 = vmatpush3.bf16.msra.mxu1 %v2957_v37 }
 0x660   :  { %2488 = vmatprep.subr.bf16.mxu1 %v2960_v41 }
 0x661   :  { %2040 = vmatprep.mubr.f32.mxu1 %v903_v38 }
 0x662   :  { %2041 = vmatmul.mubr.f32.gmra.mrb[18].mxu1 %v904_v39  ;;  %v1082_v39 = vld [vmem:[#allocation10 + $0xa0] sm:$0xff] }
 0x663   :  { %2490 = vmatpush3.bf16.msra.mxu1 %v2960_v41 }
 0x664   :  { %2492 = vmatprep.subr.bf16.mxu1 %v2965_v49 }
 0x667   :  { %2494 = vmatpush3.bf16.msra.mxu1 %v2965_v49 }
 0x668   :  { %2496 = vmatprep.subr.bf16.mxu1 %v2969_v58 }
 0x66b   :  { %2498 = vmatpush3.bf16.msra.mxu1 %v2969_v58 }
 0x66c   :  { %2500 = vmatprep.subr.bf16.mxu1 %v2973_v1 }
 0x66f   :  { %2502 = vmatpush3.bf16.msra.mxu1 %v2973_v1 }
 0x670   :  { %2504 = vmatprep.subr.bf16.mxu1 %v2977_v5 }
 0x673   :  { %2506 = vmatpush3.bf16.msra.mxu1 %v2977_v5 }
 0x674   :  { %2508 = vmatprep.subr.bf16.mxu1 %v2994_v15 }
 0x677   :  { %2510 = vmatpush3.bf16.msra.mxu1 %v2994_v15 }
 0x678   :  { %2512 = vmatprep.subr.bf16.mxu1 %v3007_v20 }
 0x67b   :  { %2514 = vmatpush3.bf16.msra.mxu1 %v3007_v20 }
 0x67c   :  { %2547 = vmatprep.subr.bf16.mxu1 %v2957_v37 }
 0x731   :  { %v2039_v45 = vpop.f32.mrb[16].mxu1 }
 0x732   :  { %v977_v46 = vadd.f32 1e-05, %v2039_v45  ;;  %v971_v47 = vpop.f32.mrb[17].mxu1  ;;  %v1083_v45 = vld [vmem:[#allocation10 + $0xa8] sm:$0xff] }
 0x733   :  { %v972_v48 = vadd.f32 1e-05, %v971_v47 }
 0x734   :  { %2651 = vrsqrt.f32 %v977_v46 }
 0x735   :  { %2653 = vrsqrt.f32 %v972_v48  ;;  %v2042_v50 = vpop.f32.mrb[18].mxu1 }
 0x736   :  { %v987_v51 = vadd.f32 1e-05, %v2042_v50  ;;  %v981_v44 = vpop.f32.mrb[19].mxu1  ;;  %v2427_v50 = vpack.c.bf16 %v1083_v45, %v1082_v39  ;;  %v1066_v39 = vld [vmem:[#allocation8 + $0xa8] sm:$0xff] }
 0x737   :  { %v982_v40 = vadd.f32 1e-05, %v981_v44  ;;  %v1085_v44 = vld [vmem:[#allocation10 + $0xb8] sm:$0xff] }
 0x738   :  { %2655 = vrsqrt.f32 %v987_v51  ;;  %v1084_v51 = vld [vmem:[#allocation10 + $0xb0] sm:$0xff] }
 0x739   :  { %2657 = vrsqrt.f32 %v982_v40  ;;  %v2431_v40 = vpack.c.bf16 %v1085_v44, %v1084_v51  ;;  %v1069_v44 = vld [vmem:[#allocation8 + $0xc0] sm:$0xff] }
 0x73e   :  { %v2652_v52 = vpop.eup %2651 }
 0x73f   :  { %v2654_v54 = vpop.eup %2653  ;;  %v995_v55 = vmul.f32 %v2652_v52, %v898_v34  ;;  %v1086_v52 = vld [vmem:[#allocation10 + $0xc0] sm:$0xff] }
 0x740   :  { %v994_v56 = vmul.f32 %v2654_v54, %v897_v28  ;;  %v1079_v28 = vld [vmem:[#allocation10 + $0x88] sm:$0xff] }
 0x741   :  { %v1004_v59 = vmul.f32 %v1553_v53, %v995_v55  ;;  %v2419_v35 = vpack.c.bf16 %v1079_v28, %v1078_v27  ;;  %v1088_v55 = vld [vmem:[#allocation10 + $0xd0] sm:$0xff] }
 0x742   :  { %v2656_v60 = vpop.eup %2655  ;;  %v1003_v61 = vmul.f32 %v1553_v53, %v994_v56  ;;  %v1089_v56 = vld [vmem:[#allocation10 + $0xd8] sm:$0xff] }
 0x743   :  { %v2658_v62 = vpop.eup %2657  ;;  %v997_v63 = vmul.f32 %v2656_v60, %v900_v32  ;;  %v1013_v0 = vadd.f32 %v1554_v57, %v1004_v59  ;;  %2420 = vmatprep.subr.bf16.mxu0 %v2419_v35  ;;  %v1090_v59 = vld [vmem:[#allocation10 + $0xe0] sm:$0xff]  ;;  %v1091_v60 = vld [vmem:[#allocation10 + $0xe8] sm:$0xff] }
 0x744   :  { %v996_v2 = vmul.f32 %v2658_v62, %v899_v36  ;;  %v1012_v3 = vadd.f32 %v1554_v57, %v1003_v61  ;;  %v1081_v36 = vld [vmem:[#allocation10 + $0x98] sm:$0xff]  ;;  %2422 = vmatpush3.bf16.msra.mxu0 %v2419_v35  ;;  %v2443_v61 = vpack.c.bf16 %v1091_v60, %v1090_v59  ;;  %v1092_v62 = vld [vmem:[#allocation10 + $0xf0] sm:$0xff] }
 0x745   :  { %v1017_v4 = vmax.f32 %v1013_v0, 0.0  ;;  %v1006_v6 = vmul.f32 %v1553_v53, %v997_v63  ;;  %v2423_v38 = vpack.c.bf16 %v1081_v36, %v1080_v29  ;;  %v1093_v63 = vld [vmem:[#allocation10 + $0xf8] sm:$0xff]  ;;  %v1063_v29 = vld [vmem:[#allocation8 + $0x90] sm:$0xff] }
 0x746   :  { %v1016_v7 = vmax.f32 %v1012_v3, 0.0  ;;  %v1005_v8 = vmul.f32 %v1553_v53, %v996_v2  ;;  %v1087_v53 = vld [vmem:[#allocation10 + $0xc8] sm:$0xff]  ;;  %v2447_v0 = vpack.c.bf16 %v1093_v63, %v1092_v62  ;;  %v1061_v2 = vld [vmem:[#allocation8 + $0x80] sm:$0xff]  ;;  %v1075_v60 = vld [vmem:[#allocation8 + $0xf0] sm:$0xff] }
 0x747   :  { %v3120_v9 = vmul.f32 %v3015_v21, %v1017_v4  ;;  %v1015_v10 = vadd.f32 %v1554_v57, %v1006_v6  ;;  %2424 = vmatprep.subr.bf16.mxu0 %v2423_v38  ;;  %v2435_v54 = vpack.c.bf16 %v1087_v53, %v1086_v52  ;;  %v1062_v3 = vld [vmem:[#allocation8 + $0x88] sm:$0xff]  ;;  %v1071_v53 = vld [vmem:[#allocation8 + $0xd0] sm:$0xff] }
 0x748   :  { %v3123_v11 = vmul.f32 %v1016_v7, %v3017_v22  ;;  %v1014_v12 = vadd.f32 %v1554_v57, %v1005_v8  ;;  %2426 = vmatpush3.bf16.msra.mxu0 %v2423_v38  ;;  %v2439_v57 = vpack.c.bf16 %v1089_v56, %v1088_v55  ;;  %v2451_v4 = vpack.c.bf16 %v1062_v3, %v1061_v2  ;;  %v1065_v38 = vld [vmem:[#allocation8 + $0xa0] sm:$0xff] }
 0x749   :  { %v1019_v13 = vmax.f32 %v1015_v10, 0.0  ;;  %2428 = vmatprep.subr.bf16.mxu0 %v2427_v50  ;;  %v1073_v56 = vld [vmem:[#allocation8 + $0xe0] sm:$0xff] }
 0x74a   :  { %v2613_v25 = vpack.i.bf16 %v3120_v9, %v3123_v11  ;;  %v1018_v14 = vmax.f32 %v1014_v12, 0.0 }
 0x74b   :  { %v3128_v16 = vmul.f32 %v3022_v42, %v1019_v13 }
 0x74c   :  { %2614 = vrot.lane.b32.xlu0 %v2613_v25, %s2813_s28  ;;  %v3132_v17 = vmul.f32 %v1018_v14, %v3024_v43  ;;  %2430 = vmatpush3.bf16.msra.mxu0 %v2427_v50  ;;  %v1068_v50 = vld [vmem:[#allocation8 + $0xb8] sm:$0xff] }
 0x74d   :  { %2432 = vmatprep.subr.bf16.mxu0 %v2431_v40 }
 0x74e   :  { %v2618_v18 = vpack.i.bf16 %v3128_v16, %v3132_v17 }
 0x750   :  { %2619 = vrot.lane.b32.xlu1 %v2618_v18, %s2813_s28  ;;  %2434 = vmatpush3.bf16.msra.mxu0 %v2431_v40  ;;  %v1070_v40 = vld [vmem:[#allocation8 + $0xc8] sm:$0xff] }
 0x751   :  { %2436 = vmatprep.subr.bf16.mxu0 %v2435_v54  ;;  %v2467_v52 = vpack.c.bf16 %v1070_v40, %v1069_v44 }
 0x754   :  { %2438 = vmatpush3.bf16.msra.mxu0 %v2435_v54  ;;  %v1072_v54 = vld [vmem:[#allocation8 + $0xd8] sm:$0xff] }
 0x755   :  { %2440 = vmatprep.subr.bf16.mxu0 %v2439_v57  ;;  %v2471_v55 = vpack.c.bf16 %v1072_v54, %v1071_v53 }
 0x758   :  { %2442 = vmatpush3.bf16.msra.mxu0 %v2439_v57  ;;  %v1074_v57 = vld [vmem:[#allocation8 + $0xe8] sm:$0xff] }
 0x759   :  { %2444 = vmatprep.subr.bf16.mxu0 %v2443_v61  ;;  %v2475_v59 = vpack.c.bf16 %v1074_v57, %v1073_v56 }
 0x75c   :  { %2446 = vmatpush3.bf16.msra.mxu0 %v2443_v61  ;;  %v1076_v61 = vld [vmem:[#allocation8 + $0xf8] sm:$0xff] }
 0x75d   :  { %2448 = vmatprep.subr.bf16.mxu0 %v2447_v0 }
 0x760   :  { %2450 = vmatpush3.bf16.msra.mxu0 %v2447_v0 }
 0x761   :  { %2452 = vmatprep.subr.bf16.mxu0 %v2451_v4 }
 0x7be   :  { %v2615_v19 = vpop.permute.xlu0 %2614 }
 0x7bf   :  { %v2617_v24 = vunpack.i.h.bf16 %v2615_v19  ;;  %v2616_v26 = vunpack.i.l.bf16 %v2615_v19 }
 0x7c1   :  { %v1033_v23 = vmax.f32 %v3120_v9, %v2617_v24  ;;  %v1032_v33 = vmax.f32 %v3123_v11, %v2616_v26 }
 0x7c2   :  { %v2620_v34 = vpop.permute.xlu1 %2619 }
 0x7c3   :  { %v2622_v30 = vunpack.i.h.bf16 %v2620_v34  ;;  %v2621_v31 = vunpack.i.l.bf16 %v2620_v34  ;;  %v2623_v32 = vpack.i.bf16 %v1033_v23, %v1032_v33 }
 0x7c5   :  { %v1035_v46 = vmax.f32 %v3128_v16, %v2622_v30  ;;  %v1034_v47 = vmax.f32 %v3132_v17, %v2621_v31  ;;  %2624 = vrot.lane.b32.xlu0 %v2623_v32, %s2816_s11  ;;  %v1064_v30 = vld [vmem:[#allocation8 + $0x98] sm:$0xff] }
 0x7c7   :  { %v2628_v48 = vpack.i.bf16 %v1035_v46, %v1034_v47 }
 0x7c9   :  { %2629 = vrot.lane.b32.xlu1 %v2628_v48, %s2816_s11  ;;  %v1067_v48 = vld [vmem:[#allocation8 + $0xb0] sm:$0xff] }
 0x7ca   :  { %v2463_v51 = vpack.c.bf16 %v1068_v50, %v1067_v48 }
 0x837   :  { %v2625_v6 = vpop.permute.xlu0 %2624 }
 0x838   :  { %v2627_v7 = vunpack.i.h.bf16 %v2625_v6  ;;  %v2626_v8 = vunpack.i.l.bf16 %v2625_v6 }
 0x83a   :  { %v1045_v10 = vmax.f32 %v1033_v23, %v2627_v7  ;;  %v1044_v12 = vmax.f32 %v1032_v33, %v2626_v8  ;;  %v2455_v33 = vpack.c.bf16 %v1064_v30, %v1063_v29  ;;  %v1557_v30 = vld [vmem:[%s3229_s9 + $0x2] ss:$0 sm:$0xff] }
 0x83b   :  { %v2630_v13 = vpop.permute.xlu1 %2629 }
 0x83c   :  { %v2632_v25 = vunpack.i.h.bf16 %v2630_v13  ;;  %v2631_v14 = vunpack.i.l.bf16 %v2630_v13  ;;  %v2633_v18 = vpack.i.bf16 %v1045_v10, %v1044_v12 }
 0x83e   :  { %v1047_v19 = vmax.f32 %v1035_v46, %v2632_v25  ;;  %v1046_v24 = vmax.f32 %v1034_v47, %v2631_v14  ;;  %2634 = vrot.lane.b32.xlu0 %v2633_v18, %s2817_s5  ;;  %v2459_v47 = vpack.c.bf16 %v1066_v39, %v1065_v38 }
 0x840   :  { %v2638_v26 = vpack.i.bf16 %v1047_v19, %v1046_v24 }
 0x842   :  { %2639 = vrot.lane.b32.xlu1 %v2638_v26, %s2817_s5 }
 0x8b0   :  { %v2635_v34 = vpop.permute.xlu0 %2634 }
 0x8b1   :  { %v2637_v27 = vunpack.i.h.bf16 %v2635_v34  ;;  %v2636_v28 = vunpack.i.l.bf16 %v2635_v34 }
 0x8b3   :  { %v1057_v31 = vmax.f32 %v1045_v10, %v2637_v27  ;;  %v1056_v32 = vmax.f32 %v1044_v12, %v2636_v28  ;;  %v1556_v27 = vld [vmem:[%s3228_s8 + $0x2] ss:$0 sm:$0xff]  ;;  %s2818_s8 = smov [#allocation11]  }
 0x8b4   :  { %v2640_v23 = vpop.permute.xlu1 %2639  ;;  %s1531_s9 = sshll.u32 %s2818_s8, 4  ;;  %s1532_s9 = int_to_ptr.vmem [resolvable:$true] %s1531_s9 }
 0x8b5   :  { %v2642_v35 = vunpack.i.h.bf16 %v2640_v23  ;;  %v2641_v36 = vunpack.i.l.bf16 %v2640_v23  ;;  %2075 = vmatprep.mubr.f32.mxu0 %v1056_v32  ;;  %p2782_p13 = scmp.lt.s32.totalorder %s1532_s9, %s1532_s9 }
 0x8b6   :  { %2076 = vmatmul.mubr.f32.vlgmr.msra.gmra.mrb[12].mxu0 %v1057_v31 }
 0x8b7   :  { %v1059_v45 = vmax.f32 %v1047_v19, %v2642_v35  ;;  %v1058_v46 = vmax.f32 %v1046_v24, %v2641_v36  ;;  %2454 = vmatpush3.bf16.msra.mxu0 %v2451_v4 }
 0x8b8   :  { %2456 = vmatprep.subr.bf16.mxu0 %v2455_v33 }
 0x8b9   :  { %2078 = vmatprep.mubr.f32.mxu0 %v1058_v46 }
 0x8ba   :  { %2079 = vmatmul.mubr.f32.gmra.mrb[14].mxu0 %v1059_v45 }
 0x8bb   :  { %2458 = vmatpush3.bf16.msra.mxu0 %v2455_v33  ;;  %2113 = vmatprep.mubr.f32.mxu0 %v3123_v11  ;;  %v2479_v11 = vpack.c.bf16 %v1076_v61, %v1075_v60 }
 0x8bc   :  { %2460 = vmatprep.subr.bf16.mxu0 %v2459_v47 }
 0x8bf   :  { %2462 = vmatpush3.bf16.msra.mxu0 %v2459_v47 }
 0x8c0   :  { %2464 = vmatprep.subr.bf16.mxu0 %v2463_v51 }
 0x8c3   :  { %2466 = vmatpush3.bf16.msra.mxu0 %v2463_v51 }
 0x8c4   :  { %2468 = vmatprep.subr.bf16.mxu0 %v2467_v52 }
 0x8c7   :  { %2470 = vmatpush3.bf16.msra.mxu0 %v2467_v52 }
 0x8c8   :  { %2472 = vmatprep.subr.bf16.mxu0 %v2471_v55 }
 0x8cb   :  { %2474 = vmatpush3.bf16.msra.mxu0 %v2471_v55 }
 0x8cc   :  { %2476 = vmatprep.subr.bf16.mxu0 %v2475_v59 }
 0x8cf   :  { %2478 = vmatpush3.bf16.msra.mxu0 %v2475_v59 }
 0x8d0   :  { %2480 = vmatprep.subr.bf16.mxu0 %v2479_v11 }
 0x8d3   :  { %2482 = vmatpush3.bf16.msra.mxu0 %v2479_v11 }
 0x8d4   :  { %2516 = vmatprep.subr.bf16.mxu0 %v2957_v37 }
 0x8d6   :  { %2114 = vmatmul.mubr.f32.vlgmr.msra.gmra.mrb[12].mxu0 %v3120_v9  ;;  %v1555_v9 = vld [vmem:[%s3227_s7 + $0x2] ss:$0 sm:$0xff] }
 0x8d7   :  { %2116 = vmatprep.mubr.f32.mxu0 %v3132_v17  ;;  %2518 = vmatpush3.bf16.msra.mxu0 %v2957_v37 }
 0x8d8   :  { %2520 = vmatprep.subr.bf16.mxu0 %v2960_v41 }
 0x8da   :  { %2117 = vmatmul.mubr.f32.gmra.mrb[14].mxu0 %v3128_v16 }
 0x8db   :  { %2522 = vmatpush3.bf16.msra.mxu0 %v2960_v41 }
 0x8dc   :  { %2524 = vmatprep.subr.bf16.mxu0 %v2965_v49 }
 0x8df   :  { %2526 = vmatpush3.bf16.msra.mxu0 %v2965_v49 }
 0x8e0   :  { %2528 = vmatprep.subr.bf16.mxu0 %v2969_v58 }
 0x8e3   :  { %2530 = vmatpush3.bf16.msra.mxu0 %v2969_v58 }
 0x8e4   :  { %2532 = vmatprep.subr.bf16.mxu0 %v2973_v1 }
 0x8e7   :  { %2534 = vmatpush3.bf16.msra.mxu0 %v2973_v1 }
 0x8e8   :  { %2536 = vmatprep.subr.bf16.mxu0 %v2977_v5 }
 0x8eb   :  { %2538 = vmatpush3.bf16.msra.mxu0 %v2977_v5 }
 0x8ec   :  { %2540 = vmatprep.subr.bf16.mxu0 %v2994_v15 }
 0x8ef   :  { %2542 = vmatpush3.bf16.msra.mxu0 %v2994_v15 }
 0x8f0   :  { %2544 = vmatprep.subr.bf16.mxu0 %v3007_v20 }
 0x8f3   :  { %2546 = vmatpush3.bf16.msra.mxu0 %v3007_v20 }
 0x9a9   :  { %v2115_v16 = vpop.f32.mrb[12].mxu0 }
 0x9aa   :  { %v1245_v17 = vpop.f32.mrb[13].mxu0  ;;  %v1270_v63 = vadd.f32 %v2115_v16, %v1555_v9 }
 0x9ab   :  { %v1269_v62 = vadd.f32 %v1555_v9, %v1245_v17 }
 0x9ad   :  { %v2118_v0 = vpop.f32.mrb[14].mxu0  ;;  %2151 = vmatprep.mubr.f32.mxu1 %v1269_v62 }
 0x9ae   :  { %v1255_v2 = vpop.f32.mrb[15].mxu0  ;;  %2152 = vmatmul.mubr.f32.vlgmr.msra.gmra.mrb[20].mxu1 %v1270_v63  ;;  %v1272_v4 = vadd.f32 %v2118_v0, %v1555_v9 }
 0x9af   :  { %v1271_v3 = vadd.f32 %v1555_v9, %v1255_v2  ;;  %2555 = vmatpush3.bf16.msra.mxu1 %v2957_v37 }
 0x9b0   :  { %2548 = vmatprep.subr.bf16.mxu1 %v2960_v41 }
 0x9b1   :  { %2154 = vmatprep.mubr.f32.mxu1 %v1271_v3 }
 0x9b2   :  { %2155 = vmatmul.mubr.f32.gmra.mrb[22].mxu1 %v1272_v4 }
 0x9b3   :  { %2556 = vmatpush3.bf16.msra.mxu1 %v2960_v41 }
 0x9b4   :  { %2549 = vmatprep.subr.bf16.mxu1 %v2965_v49 }
 0x9b7   :  { %2557 = vmatpush3.bf16.msra.mxu1 %v2965_v49 }
 0x9b8   :  { %2550 = vmatprep.subr.bf16.mxu1 %v2969_v58 }
 0x9bb   :  { %2558 = vmatpush3.bf16.msra.mxu1 %v2969_v58 }
 0x9bc   :  { %2551 = vmatprep.subr.bf16.mxu1 %v2973_v1 }
 0x9bf   :  { %2559 = vmatpush3.bf16.msra.mxu1 %v2973_v1 }
 0x9c0   :  { %2552 = vmatprep.subr.bf16.mxu1 %v2977_v5 }
 0x9c3   :  { %2560 = vmatpush3.bf16.msra.mxu1 %v2977_v5 }
 0x9c4   :  { %2553 = vmatprep.subr.bf16.mxu1 %v2994_v15 }
 0x9c7   :  { %2561 = vmatpush3.bf16.msra.mxu1 %v2994_v15 }
 0x9c8   :  { %2554 = vmatprep.subr.bf16.mxu1 %v3007_v20 }
 0x9cb   :  { %2562 = vmatpush3.bf16.msra.mxu1 %v3007_v20 }
 0xa81   :  { %v2153_v37 = vpop.f32.mrb[20].mxu1 }
 0xa82   :  { %v1359_v41 = vsub.f32 %v1270_v63, %v2153_v37  ;;  %v1339_v49 = vpop.f32.mrb[21].mxu1 }
 0xa83   :  { %v1358_v58 = vsub.f32 %v1269_v62, %v1339_v49 }
 0xa84   :  { %v1363_v8 = vmul.f32 %v1359_v41, %v1359_v41 }
 0xa85   :  { %v1362_v6 = vmul.f32 %v1358_v58, %v1358_v58  ;;  %v2156_v7 = vpop.f32.mrb[22].mxu1 }
 0xa86   :  { %v1361_v1 = vsub.f32 %v1272_v4, %v2156_v7  ;;  %v1349_v10 = vpop.f32.mrb[23].mxu1 }
 0xa87   :  { %v1360_v12 = vsub.f32 %v1271_v3, %v1349_v10  ;;  %2189 = vmatprep.mubr.f32.mxu0 %v1362_v6 }
 0xa88   :  { %2190 = vmatmul.mubr.f32.vlgmr.msra.gmra.mrb[16].mxu0 %v1363_v8  ;;  %v1365_v13 = vmul.f32 %v1361_v1, %v1361_v1 }
 0xa89   :  { %v1364_v5 = vmul.f32 %v1360_v12, %v1360_v12 }
 0xa8b   :  { %2192 = vmatprep.mubr.f32.mxu1 %v1364_v5 }
 0xa8c   :  { %2193 = vmatmul.mubr.f32.vlgmr.msra.gmra.mrb[24].mxu1 %v1365_v13 }
 0xb5b   :  { %v2191_v15 = vpop.f32.mrb[16].mxu0 }
 0xb5c   :  { %v1438_v25 = vadd.f32 1e-05, %v2191_v15  ;;  %v1432_v14 = vpop.f32.mrb[17].mxu0 }
 0xb5d   :  { %v1433_v20 = vadd.f32 1e-05, %v1432_v14 }
 0xb5e   :  { %2659 = vrsqrt.f32 %v1438_v25 }
 0xb5f   :  { %2661 = vrsqrt.f32 %v1433_v20  ;;  %v2194_v18 = vpop.f32.mrb[24].mxu1 }
 0xb60   :  { %v1448_v19 = vadd.f32 1e-05, %v2194_v18  ;;  %v1442_v24 = vpop.f32.mrb[25].mxu1 }
 0xb61   :  { %v1443_v26 = vadd.f32 1e-05, %v1442_v24 }
 0xb62   :  { %2663 = vrsqrt.f32 %v1448_v19 }
 0xb63   :  { %2665 = vrsqrt.f32 %v1443_v26 }
 0xb68   :  { %v2660_v34 = vpop.eup %2659 }
 0xb69   :  { %v2662_v28 = vpop.eup %2661  ;;  %v1456_v29 = vmul.f32 %v2660_v34, %v1359_v41 }
 0xb6a   :  { %v1455_v31 = vmul.f32 %v2662_v28, %v1358_v58 }
 0xb6b   :  { %v1465_v32 = vmul.f32 %v1556_v27, %v1456_v29 }
 0xb6c   :  { %v2664_v23 = vpop.eup %2663  ;;  %v1464_v33 = vmul.f32 %v1556_v27, %v1455_v31 }
 0xb6d   :  { %v2666_v35 = vpop.eup %2665  ;;  %v1474_v36 = vadd.f32 %v1557_v30, %v1465_v32  ;;  %v1458_v38 = vmul.f32 %v2664_v23, %v1361_v1 }
 0xb6e   :  { %v1473_v39 = vadd.f32 %v1557_v30, %v1464_v33  ;;  %v1457_v45 = vmul.f32 %v2666_v35, %v1360_v12 }
 0xb6f   :  { %v1478_v46 = vmax.f32 %v1474_v36, 0.0  ;;  %v1467_v47 = vmul.f32 %v1556_v27, %v1458_v38 }
 0xb70   :  { %v1477_v48 = vmax.f32 %v1473_v39, 0.0  ;;  %v1466_v50 = vmul.f32 %v1556_v27, %v1457_v45 }
 0xb71   :  { %v1482_v51 = vmul.f32 %v3015_v21, %v1478_v46  ;;  %v1476_v44 = vadd.f32 %v1557_v30, %v1467_v47 }
 0xb72   :  { %v1481_v40 = vmul.f32 %v1477_v48, %v3017_v22  ;;  %v1475_v52 = vadd.f32 %v1557_v30, %v1466_v50 }
 0xb73   :  { %1487 = vrot.lane.b32.xlu1 %v1482_v51, %s2813_s28  ;;  %v1480_v53 = vmax.f32 %v1476_v44, 0.0 }
 0xb74   :  { %1485 = vrot.lane.b32.xlu0 %v1481_v40, %s2813_s28  ;;  %v1479_v54 = vmax.f32 %v1475_v52, 0.0 }
 0xb75   :  { %v1484_v55 = vmul.f32 %v3022_v42, %v1480_v53 }
 0xb76   :  { %v1483_v56 = vmul.f32 %v1479_v54, %v3024_v43 }
 0xb77   :  { %1491 = vrot.lane.b32.xlu1 %v1484_v55, %s2813_s28 }
 0xb78   :  { %1489 = vrot.lane.b32.xlu0 %v1483_v56, %s2813_s28  ;;  %s2777_s28 = scalar_lea.vmem %s1532_s9, 512 }
 0xb79   :  { %p2778_p12 = scmp.ne.s32.totalorder %s1532_s9, %s2777_s28  ;;  %p2783_p0 = scmp.lt.s32.totalorder %s2777_s28, %s2777_s28 }
 0xb7b   :  { %p2784_p1 = por %p2783_p0, %p2782_p13 }
 0xb7d   :  { %p2785_p2 = pnand %p2784_p1, %p2778_p12 }
 0xbe5   :  { %v1488_v57 = vpop.permute.xlu1 %1487 }
 0xbe6   :  { %v1494_v21 = vmax.f32 %v1482_v51, %v1488_v57  ;;  %v1486_v59 = vpop.permute.xlu0 %1485 }
 0xbe7   :  { %v1493_v60 = vmax.f32 %v1481_v40, %v1486_v59 }
 0xbe8   :  { %1499 = vrot.lane.b32.xlu1 %v1494_v21, %s2816_s11 }
 0xbe9   :  { %v1492_v22 = vpop.permute.xlu1 %1491  ;;  %1497 = vrot.lane.b32.xlu0 %v1493_v60, %s2816_s11 }
 0xbea   :  { %v1496_v61 = vmax.f32 %v1484_v55, %v1492_v22  ;;  %v1490_v11 = vpop.permute.xlu0 %1489 }
 0xbeb   :  { %v1495_v9 = vmax.f32 %v1483_v56, %v1490_v11 }
 0xbec   :  { %1503 = vrot.lane.b32.xlu1 %v1496_v61, %s2816_s11 }
 0xbed   :  { %1501 = vrot.lane.b32.xlu0 %v1495_v9, %s2816_s11 }
 0xc5a   :  { %v1500_v42 = vpop.permute.xlu1 %1499 }
 0xc5b   :  { %v1506_v43 = vmax.f32 %v1494_v21, %v1500_v42  ;;  %v1498_v16 = vpop.permute.xlu0 %1497 }
 0xc5c   :  { %v1505_v17 = vmax.f32 %v1493_v60, %v1498_v16 }
 0xc5d   :  { %1511 = vrot.lane.b32.xlu1 %v1506_v43, %s2817_s5 }
 0xc5e   :  { %v1504_v62 = vpop.permute.xlu1 %1503  ;;  %1509 = vrot.lane.b32.xlu0 %v1505_v17, %s2817_s5 }
 0xc5f   :  { %v1508_v63 = vmax.f32 %v1496_v61, %v1504_v62  ;;  %v1502_v0 = vpop.permute.xlu0 %1501 }
 0xc60   :  { %v1507_v2 = vmax.f32 %v1495_v9, %v1502_v0 }
 0xc61   :  { %1515 = vrot.lane.b32.xlu1 %v1508_v63, %s2817_s5 }
 0xc62   :  { %1513 = vrot.lane.b32.xlu0 %v1507_v2, %s2817_s5 }
 0xccf   :  { %v1512_v3 = vpop.permute.xlu1 %1511 }
 0xcd0   :  { %v1518_v4 = vmax.f32 %v1506_v43, %v1512_v3  ;;  %v1510_v37 = vpop.permute.xlu0 %1509 }
 0xcd1   :  { %v1517_v41 = vmax.f32 %v1505_v17, %v1510_v37 }
 0xcd2   :  { %1523 = vst.msk [vmem:[#allocation11 + $0x8] sm:$0xff] %vm1521_vm1, %v1518_v4 }
 0xcd3   :  { %1522 = vst.msk [vmem:[#allocation11] sm:$0xff] %vm1521_vm1, %v1517_v41  ;;  %v1516_v49 = vpop.permute.xlu1 %1515 }
 0xcd4   :  { %v1520_v58 = vmax.f32 %v1508_v63, %v1516_v49  ;;  %v1514_v6 = vpop.permute.xlu0 %1513 }
 0xcd5   :  { %v1519_v7 = vmax.f32 %v1507_v2, %v1514_v6 }
 0xcd6   :  { %1525 = vst.msk [vmem:[#allocation11 + $0x18] sm:$0xff] %vm1521_vm1, %v1520_v58 }
 0xcd7   :  { %1524 = vst.msk [vmem:[#allocation11 + $0x10] sm:$0xff] %vm1521_vm1, %v1519_v7 }
 0xcd8   :  { %2788 = shalt.err (!%p2785_p2)
}
 0xcd9   :  { %s2789_s21 = scalar_lea.hbm %s3230_s10, 512 }
 0xcda   :  { %p2790_p3 = scmp.ne.s32.totalorder %s3230_s10, %s2789_s21  ;;  %p2793_p4 = scmp.lt.u32.totalorder %s2789_s21, %s3230_s10 }
 0xcdc   :  { %p2795_p5 = pnand %p2793_p4, %p2790_p3 }
 0xcde   :  { %2798 = shalt.err (!%p2795_p5)
}
 0xcdf   :  { %1537 = dma.vmem_to_hbm [thread:$0]  %s1532_s9, 512, %s3230_s10, [#allocation4], %s2808_s23, %s2808_s23, %s2809_s24  }
 0xce0   :  { %2805 = dma.done.wait [#allocation4], 512  }
 0xce1   :  { %2806 = vsyncadd [#allocation4], 4294966784 }
 0xce2   :  { %1541 = vsyncpa [#allocation3], 1 }
 0xce3   :  { %1542 = vsyncpa [#allocation6], 1 }
 0xce4   :  { %1543 = vsyncpa [#allocation9], 1 }
 0xce5   :  { %1544 = vsyncpa [#allocation4], 1 }

</bundles_post_ra>
